<compile_context>
chip_gen: v7x
topology: tpu7x:2x2x1
jax: 0.10.0
libtpu: 0.0.40
codegen_flags: <defaults>
</compile_context>

<pallas_src>
import functools
import math

import jax
import jax.numpy as jnp
import numpy as np
from jax import lax
from jax.experimental import pallas as pl
from jax.experimental.pallas import tpu as pltpu


def _round_up(x, m):
    return (x + m - 1) // m * m


def _bilinear_resize_matrix(in_size, out_size):
    """[out, in] row matrix matching F.interpolate(bilinear, align_corners=False)."""
    o = np.arange(out_size, dtype=np.float64)
    scale = in_size / out_size
    src = np.maximum((o + 0.5) * scale - 0.5, 0.0)
    i0 = np.minimum(np.floor(src).astype(np.int64), in_size - 1)
    i1 = np.minimum(i0 + 1, in_size - 1)
    w1 = src - i0
    w0 = 1.0 - w1
    R = np.zeros((out_size, in_size), np.float64)
    rows = np.arange(out_size)
    np.add.at(R, (rows, i0), w0)
    np.add.at(R, (rows, i1), w1)
    return R.astype(np.float32)


def _col_edge_masks(H, W):
    """[2, H*W] f32 masks killing row-wrap of the flat pixel axis.
    row 0: source col = w-1 valid (w > 0)      -> dx == 0 taps
    row 1: source col = w+1 valid (w < W - 1)  -> dx == 2 taps"""
    w = np.arange(H * W) % W
    left = (w > 0).astype(np.float32)
    right = (w < W - 1).astype(np.float32)
    return np.stack([left, right], axis=0)


# ---------------------------------------------------------------------------
# Fused kernel: one grid step == one batch element.
# ---------------------------------------------------------------------------
def _mixres_kernel(hx_ref, lx_ref, hm_ref, lm_ref,
                   wq9_ref, wk9_ref, wv9_ref,
                   wq_ref, bq_ref, wk_ref, bk_ref, wv_ref, bv_ref,
                   rT_ref, h2l_ref, h2b_ref,
                   o_ref,
                   hbuf_ref, lbuf_ref,
                   *, HH, WH, HL, WL, HALO):
    f32 = jnp.float32
    NH = HH * WH
    NL = HL * WL

    # --- zero-padded, lane-contiguous flat copies of this batch's images ----
    # (zeros in the halo regions make the H-boundary of the 3x3 stencil free)
    hbuf_ref[...] = jnp.zeros_like(hbuf_ref)
    lbuf_ref[...] = jnp.zeros_like(lbuf_ref)
    hbuf_ref[:, pl.ds(HALO, NH)] = hx_ref[...]     # 128-aligned fill store
    lbuf_ref[:, pl.ds(HALO, NL)] = lx_ref[...]     # 128-aligned fill store

    def depthwise(buf_ref, m_ref, W, N, tap_w_refs):
        """3x3 depthwise conv on the flat [C, N] layout: 9 lane-shifted loads
        from the zero-padded buffer + column-edge masks + per-channel tap
        weights.  The shifted slices are shared across all tap_w_refs."""
        m_left = m_ref[pl.ds(0, 1), :]             # [1, N]
        m_right = m_ref[pl.ds(1, 1), :]            # [1, N]
        taps = [wt[...] for wt in tap_w_refs]      # each [C, 9], loaded once
        accs = [None] * len(tap_w_refs)
        for t in range(9):
            dy, dx = divmod(t, 3)
            off = (dy - 1) * W + (dx - 1)
            s = buf_ref[:, pl.ds(HALO + off, N)]   # [C, N] shifted slice
            if dx == 0:
                s = s * m_left                     # kill wrap at w == 0
            elif dx == 2:
                s = s * m_right                    # kill wrap at w == W-1
            for i, w9 in enumerate(taps):
                term = s * w9[:, t:t + 1]          # per-channel tap weight
                accs[i] = term if accs[i] is None else accs[i] + term
        return accs

    (q_dw,) = depthwise(hbuf_ref, hm_ref, WH, NH, (wq9_ref,))
    k_dw, v_dw = depthwise(lbuf_ref, lm_ref, WL, NL, (wk9_ref, wv9_ref))

    # --- pointwise 1x1 convs (MXU).  1/sqrt(CL) and the depthwise biases are
    # pre-folded into wq/bq, bk, bv in the wrapper. ---
    q = jnp.dot(wq_ref[...], q_dw, preferred_element_type=f32) + bq_ref[...]
    k = jnp.dot(wk_ref[...], k_dw, preferred_element_type=f32) + bk_ref[...]
    v = jnp.dot(wv_ref[...], v_dw, preferred_element_type=f32) + bv_ref[...]

    # --- bilinear resize of K (dense Kronecker matrix), QK^T, softmax, PV ---
    k_int = jnp.dot(k, rT_ref[...], preferred_element_type=f32)        # [CL, NH]
    scores = lax.dot_general(q, k_int, (((1,), (1,)), ((), ())),
                             preferred_element_type=f32)               # [CH, CL]
    m = jnp.max(scores, axis=-1, keepdims=True)
    e = jnp.exp(scores - m)
    probs = e * pl.reciprocal(jnp.sum(e, axis=-1, keepdims=True),
                              approx=False)
    ao = jnp.dot(probs, v, preferred_element_type=f32)                 # [CH, NL]

    # --- high_to_low 1x1 conv with folded eval-mode BatchNorm ---
    o_ref[...] = (jnp.dot(h2l_ref[...], ao, preferred_element_type=f32)
                  + h2b_ref[...])


# ---------------------------------------------------------------------------
# Wrapper: parameter folding, static constants, BlockSpecs.
# ---------------------------------------------------------------------------
@jax.jit
def mixres_attention_forward(high_x, low_x, p):
    B, CH, HH, WH = high_x.shape
    _, CL, HL, WL = low_x.shape
    assert WH == HH, "torch matmul Q@K^T requires square high-res input"
    NH, NL = HH * WH, HL * WL

    HALO = 128                              # aligned fill offset, >= W + 1
    assert WH + 1 <= HALO and WL + 1 <= HALO
    HTOT = _round_up(HALO + NH + WH + 1, 128)
    LTOT = _round_up(HALO + NL + WL + 1, 128)

    # free reshapes of the natural NCHW layout (no HBM relayout)
    hx = high_x.reshape(B, CH, NH)
    lx = low_x.reshape(B, CL, NL)

    # depthwise tap weights as [C, 9]
    wq9 = p['dwq_w'].reshape(CH, 9)
    wk9 = p['dwk_w'].reshape(CL, 9)
    wv9 = p['dwv_w'].reshape(CL, 9)

    # fold depthwise bias through the pointwise conv; fold 1/sqrt(CL) into Q
    inv_scale = 1.0 / math.sqrt(CL)
    wq_s = p['pwq_w'] * inv_scale
    bq_s = ((p['pwq_w'] @ p['dwq_b'] + p['pwq_b']) * inv_scale)[:, None]
    bk = (p['pwk_w'] @ p['dwk_b'] + p['pwk_b'])[:, None]
    bv = (p['pwv_w'] @ p['dwv_b'] + p['pwv_b'])[:, None]

    # fold eval-mode BatchNorm into the (bias-free) high_to_low 1x1 conv
    bn_scale = p['bn_gamma'] / jnp.sqrt(p['bn_var'] + 1e-5)
    h2l_w = p['h2l_w'] * bn_scale[:, None]
    h2l_b = (p['bn_beta'] - p['bn_mean'] * bn_scale)[:, None]

    # static constants: column-edge masks and the bilinear interpolation
    # matrix for F.interpolate(K, size=(HH, HH)), transposed: [NL, HH*HH].
    hmask = jnp.asarray(_col_edge_masks(HH, WH))
    lmask = jnp.asarray(_col_edge_masks(HL, WL))
    rT = jnp.asarray(np.kron(_bilinear_resize_matrix(HL, HH),
                             _bilinear_resize_matrix(WL, HH)).T)

    def rep(shape):  # replicated (weight-like) operand, full-array block
        return pl.BlockSpec(shape, lambda b: (0,) * len(shape))

    kernel = functools.partial(_mixres_kernel, HH=HH, WH=WH, HL=HL, WL=WL,
                               HALO=HALO)

    out = pl.pallas_call(
        kernel,
        out_shape=jax.ShapeDtypeStruct((B, CL, NL), jnp.float32),
        grid=(B,),
        in_specs=[
            pl.BlockSpec((None, CH, NH), lambda b: (b, 0, 0)),
            pl.BlockSpec((None, CL, NL), lambda b: (b, 0, 0)),
            rep((2, NH)), rep((2, NL)),
            rep((CH, 9)), rep((CL, 9)), rep((CL, 9)),
            rep((CH, CH)), rep((CH, 1)),
            rep((CL, CL)), rep((CL, 1)),
            rep((CL, CL)), rep((CL, 1)),
            rep((NL, NH)), rep((CL, CH)), rep((CL, 1)),
        ],
        out_specs=pl.BlockSpec((None, CL, NL), lambda b: (b, 0, 0)),
        scratch_shapes=[
            pltpu.VMEM((CH, HTOT), jnp.float32),   # zero-padded flat high img
            pltpu.VMEM((CL, LTOT), jnp.float32),   # zero-padded flat low img
        ],
        compiler_params=pltpu.CompilerParams(
            dimension_semantics=("parallel",)),
    )(hx, lx, hmask, lmask, wq9, wk9, wv9,
      wq_s, bq_s, p['pwk_w'], bk, p['pwv_w'], bv,
      rT, h2l_w, h2l_b)

    # free reshape of the last axis
    return out.reshape(B, CL, HL, WL)


def init_params(key, CH, CL):
    ks = jax.random.split(key, 16)
    n = lambda k, s, sc=0.3: sc * jax.random.normal(k, s, jnp.float32)
    return {
        'dwq_w': n(ks[0], (CH, 3, 3)), 'dwq_b': n(ks[1], (CH,), 0.1),
        'dwk_w': n(ks[2], (CL, 3, 3)), 'dwk_b': n(ks[3], (CL,), 0.1),
        'dwv_w': n(ks[4], (CL, 3, 3)), 'dwv_b': n(ks[5], (CL,), 0.1),
        'pwq_w': n(ks[6], (CH, CH)),   'pwq_b': n(ks[7], (CH,), 0.1),
        'pwk_w': n(ks[8], (CL, CL)),   'pwk_b': n(ks[9], (CL,), 0.1),
        'pwv_w': n(ks[10], (CL, CL)),  'pwv_b': n(ks[11], (CL,), 0.1),
        'h2l_w': n(ks[12], (CL, CH)),
        'bn_gamma': 1.0 + n(ks[13], (CL,), 0.1),
        'bn_beta': n(ks[14], (CL,), 0.1),
        'bn_mean': n(ks[15], (CL,), 0.1),
        'bn_var': jnp.linspace(0.8, 1.2, CL, dtype=jnp.float32),
    }


# ---------------------------------------------------------------------------
# Pure-JAX reference (highest precision) for verification.
# ---------------------------------------------------------------------------
def reference_forward(high_x, low_x, p):
    PH = lax.Precision.HIGHEST
    B, CH, HH, WH = high_x.shape
    _, CL, HL, WL = low_x.shape

    def dw(x, w, b):
        _, C, H, W = x.shape
        xp = jnp.pad(x, ((0, 0), (0, 0), (1, 1), (1, 1)))
        acc = jnp.zeros_like(x)
        for dy in range(3):
            for dx in range(3):
                acc = acc + xp[:, :, dy:dy + H, dx:dx + W] * \
                    w[:, dy, dx][None, :, None, None]
        return acc + b[None, :, None, None]

    q = dw(high_x, p['dwq_w'], p['dwq_b']).reshape(B, CH, HH * WH)
    k = dw(low_x, p['dwk_w'], p['dwk_b']).reshape(B, CL, HL * WL)
    v = dw(low_x, p['dwv_w'], p['dwv_b']).reshape(B, CL, HL * WL)
    q = jnp.einsum('oc,bcn->bon', p['pwq_w'], q, precision=PH) + p['pwq_b'][None, :, None]
    k = jnp.einsum('oc,bcn->bon', p['pwk_w'], k, precision=PH) + p['pwk_b'][None, :, None]
    v = jnp.einsum('oc,bcn->bon', p['pwv_w'], v, precision=PH) + p['pwv_b'][None, :, None]

    r_flat = jnp.kron(jnp.asarray(_bilinear_resize_matrix(HL, HH)),
                      jnp.asarray(_bilinear_resize_matrix(WL, HH)))   # [HH*HH, HL*WL]
    k_int = jnp.einsum('bcp,qp->bcq', k, r_flat, precision=PH)        # [B, CL, HH*HH]

    scores = jnp.einsum('bcn,bdn->bcd', q, k_int, precision=PH) / (CL ** 0.5)
    probs = jax.nn.softmax(scores, axis=-1)
    out = jnp.einsum('bcd,bdn->bcn', probs, v, precision=PH)
    out = jnp.einsum('oc,bcn->bon', p['h2l_w'], out, precision=PH)
    scale = p['bn_gamma'] / jnp.sqrt(p['bn_var'] + 1e-5)
    bias = p['bn_beta'] - p['bn_mean'] * scale
    out = out * scale[None, :, None] + bias[None, :, None]
    return out.reshape(B, CL, HL, WL)


if __name__ == "__main__":
    B, CH, CL = 2, 8, 4
    HH = WH = 16
    HL = WL = 8

    key = jax.random.PRNGKey(0)
    k_hi, k_lo, k_par = jax.random.split(key, 3)
    high_x = jax.random.normal(k_hi, (B, CH, HH, WH), jnp.float32)
    low_x = jax.random.normal(k_lo, (B, CL, HL, WL), jnp.float32)
    params = init_params(k_par, CH, CL)

    out = jax.block_until_ready(mixres_attention_forward(high_x, low_x, params))
    ref = jax.block_until_ready(reference_forward(high_x, low_x, params))

    assert out.shape == (B, CL, HL, WL)
    assert bool(jnp.all(jnp.isfinite(out)))
    err = float(jnp.max(jnp.abs(out - ref)))
    assert jnp.allclose(out, ref, rtol=2e-3, atol=2e-3), err

    print("KERNEL_OK")
</pallas_src>

<mosaic_0001>
module attributes {stable_mosaic.version = 11 : i64} {
  func.func @_mixres_kernel(%arg0: i32, %arg1: memref<1x8x256xf32, #tpu.memory_space<vmem>>, %arg2: memref<1x4x64xf32, #tpu.memory_space<vmem>>, %arg3: memref<2x256xf32, #tpu.memory_space<vmem>>, %arg4: memref<2x64xf32, #tpu.memory_space<vmem>>, %arg5: memref<8x9xf32, #tpu.memory_space<vmem>>, %arg6: memref<4x9xf32, #tpu.memory_space<vmem>>, %arg7: memref<4x9xf32, #tpu.memory_space<vmem>>, %arg8: memref<8x8xf32, #tpu.memory_space<vmem>>, %arg9: memref<8x1xf32, #tpu.memory_space<vmem>>, %arg10: memref<4x4xf32, #tpu.memory_space<vmem>>, %arg11: memref<4x1xf32, #tpu.memory_space<vmem>>, %arg12: memref<4x4xf32, #tpu.memory_space<vmem>>, %arg13: memref<4x1xf32, #tpu.memory_space<vmem>>, %arg14: memref<64x256xf32, #tpu.memory_space<vmem>>, %arg15: memref<4x8xf32, #tpu.memory_space<vmem>>, %arg16: memref<4x1xf32, #tpu.memory_space<vmem>>, %arg17: memref<1x4x64xf32, #tpu.memory_space<vmem>>, %arg18: memref<8x512xf32, #tpu.memory_space<vmem>>, %arg19: memref<4x256xf32, #tpu.memory_space<vmem>>) attributes {dimension_semantics = [#tpu.dimension_semantics<parallel>], iteration_bounds = array<i64: 2>, scalar_prefetch = 0 : i64, scratch_operands = 2 : i64, tpu.core_type = #tpu.core_type<tc>, window_params = [{transform_indices = @transform_0, window_bounds = array<i64: 1, 8, 256>}, {transform_indices = @transform_1, window_bounds = array<i64: 1, 4, 64>}, {pipeline_mode = #tpu.pipeline_mode<synchronous>, transform_indices = @transform_2, window_bounds = array<i64: 2, 256>}, {pipeline_mode = #tpu.pipeline_mode<synchronous>, transform_indices = @transform_3, window_bounds = array<i64: 2, 64>}, {pipeline_mode = #tpu.pipeline_mode<synchronous>, transform_indices = @transform_4, window_bounds = array<i64: 8, 9>}, {pipeline_mode = #tpu.pipeline_mode<synchronous>, transform_indices = @transform_5, window_bounds = array<i64: 4, 9>}, {pipeline_mode = #tpu.pipeline_mode<synchronous>, transform_indices = @transform_6, window_bounds = array<i64: 4, 9>}, {pipeline_mode = #tpu.pipeline_mode<synchronous>, transform_indices = @transform_7, window_bounds = array<i64: 8, 8>}, {pipeline_mode = #tpu.pipeline_mode<synchronous>, transform_indices = @transform_8, window_bounds = array<i64: 8, 1>}, {pipeline_mode = #tpu.pipeline_mode<synchronous>, transform_indices = @transform_9, window_bounds = array<i64: 4, 4>}, {pipeline_mode = #tpu.pipeline_mode<synchronous>, transform_indices = @transform_10, window_bounds = array<i64: 4, 1>}, {pipeline_mode = #tpu.pipeline_mode<synchronous>, transform_indices = @transform_11, window_bounds = array<i64: 4, 4>}, {pipeline_mode = #tpu.pipeline_mode<synchronous>, transform_indices = @transform_12, window_bounds = array<i64: 4, 1>}, {pipeline_mode = #tpu.pipeline_mode<synchronous>, transform_indices = @transform_13, window_bounds = array<i64: 64, 256>}, {pipeline_mode = #tpu.pipeline_mode<synchronous>, transform_indices = @transform_14, window_bounds = array<i64: 4, 8>}, {pipeline_mode = #tpu.pipeline_mode<synchronous>, transform_indices = @transform_15, window_bounds = array<i64: 4, 1>}, {transform_indices = @transform_16, window_bounds = array<i64: 1, 4, 64>}]} {
    %cst = arith.constant 0.000000e+00 : f32
    %0 = vector.broadcast %cst : f32 to vector<8x512xf32>
    %c0 = arith.constant 0 : index
    %c0_0 = arith.constant 0 : index
    %1 = vector.load %arg18[%c0, %c0_0] : memref<8x512xf32, #tpu.memory_space<vmem>>, vector<8x512xf32>
    tpu.vector_store %arg18[%c0, %c0_0], %0 {strides = array<i32>} : memref<8x512xf32, #tpu.memory_space<vmem>>, vector<8x512xf32>,
    %cst_1 = arith.constant 0.000000e+00 : f32
    %2 = vector.broadcast %cst_1 : f32 to vector<4x256xf32>
    %c0_2 = arith.constant 0 : index
    %c0_3 = arith.constant 0 : index
    %3 = vector.load %arg19[%c0_2, %c0_3] : memref<4x256xf32, #tpu.memory_space<vmem>>, vector<4x256xf32>
    tpu.vector_store %arg19[%c0_2, %c0_3], %2 {strides = array<i32>} : memref<4x256xf32, #tpu.memory_space<vmem>>, vector<4x256xf32>,
    %c0_4 = arith.constant 0 : index
    %c0_5 = arith.constant 0 : index
    %c0_6 = arith.constant 0 : index
    %4 = vector.load %arg1[%c0_4, %c0_5, %c0_6] : memref<1x8x256xf32, #tpu.memory_space<vmem>>, vector<1x8x256xf32>
    %5 = vector.shape_cast %4 : vector<1x8x256xf32> to vector<8x256xf32>
    %c0_7 = arith.constant 0 : index
    %c128 = arith.constant 128 : index
    %6 = vector.load %arg18[%c0_7, %c128] : memref<8x512xf32, #tpu.memory_space<vmem>>, vector<8x256xf32>
    tpu.vector_store %arg18[%c0_7, %c128], %5 {strides = array<i32>} : memref<8x512xf32, #tpu.memory_space<vmem>>, vector<8x256xf32>,
    %c0_8 = arith.constant 0 : index
    %c0_9 = arith.constant 0 : index
    %c0_10 = arith.constant 0 : index
    %7 = vector.load %arg2[%c0_8, %c0_9, %c0_10] : memref<1x4x64xf32, #tpu.memory_space<vmem>>, vector<1x4x64xf32>
    %8 = vector.shape_cast %7 : vector<1x4x64xf32> to vector<4x64xf32>
    %c0_11 = arith.constant 0 : index
    %c128_12 = arith.constant 128 : index
    %9 = vector.load %arg19[%c0_11, %c128_12] : memref<4x256xf32, #tpu.memory_space<vmem>>, vector<4x64xf32>
    tpu.vector_store %arg19[%c0_11, %c128_12], %8 {strides = array<i32>} : memref<4x256xf32, #tpu.memory_space<vmem>>, vector<4x64xf32>,
    %c0_13 = arith.constant 0 : index
    %c0_14 = arith.constant 0 : index
    %10 = vector.load %arg3[%c0_13, %c0_14] : memref<2x256xf32, #tpu.memory_space<vmem>>, vector<1x256xf32>
    %c1 = arith.constant 1 : index
    %c0_15 = arith.constant 0 : index
    %11 = vector.load %arg3[%c1, %c0_15] : memref<2x256xf32, #tpu.memory_space<vmem>>, vector<1x256xf32>
    %c0_16 = arith.constant 0 : index
    %c0_17 = arith.constant 0 : index
    %12 = vector.load %arg5[%c0_16, %c0_17] : memref<8x9xf32, #tpu.memory_space<vmem>>, vector<8x9xf32>
    %c0_18 = arith.constant 0 : index
    %c111 = arith.constant 111 : index
    %13 = vector.load %arg18[%c0_18, %c111] : memref<8x512xf32, #tpu.memory_space<vmem>>, vector<8x256xf32>
    %14 = vector.broadcast %10 : vector<1x256xf32> to vector<8x256xf32>
    %15 = arith.mulf %13, %14 : vector<8x256xf32>
    %16 = vector.extract_strided_slice %12 {offsets = [0, 0], sizes = [8, 1], strides = [1, 1]} : vector<8x9xf32> to vector<8x1xf32>
    %17 = vector.broadcast %16 : vector<8x1xf32> to vector<8x256xf32>
    %18 = arith.mulf %15, %17 : vector<8x256xf32>
    %c0_19 = arith.constant 0 : index
    %c112 = arith.constant 112 : index
    %19 = vector.load %arg18[%c0_19, %c112] : memref<8x512xf32, #tpu.memory_space<vmem>>, vector<8x256xf32>
    %20 = vector.extract_strided_slice %12 {offsets = [0, 1], sizes = [8, 1], strides = [1, 1]} : vector<8x9xf32> to vector<8x1xf32>
    %21 = vector.broadcast %20 : vector<8x1xf32> to vector<8x256xf32>
    %22 = arith.mulf %19, %21 : vector<8x256xf32>
    %23 = arith.addf %18, %22 : vector<8x256xf32>
    %c0_20 = arith.constant 0 : index
    %c113 = arith.constant 113 : index
    %24 = vector.load %arg18[%c0_20, %c113] : memref<8x512xf32, #tpu.memory_space<vmem>>, vector<8x256xf32>
    %25 = vector.broadcast %11 : vector<1x256xf32> to vector<8x256xf32>
    %26 = arith.mulf %24, %25 : vector<8x256xf32>
    %27 = vector.extract_strided_slice %12 {offsets = [0, 2], sizes = [8, 1], strides = [1, 1]} : vector<8x9xf32> to vector<8x1xf32>
    %28 = vector.broadcast %27 : vector<8x1xf32> to vector<8x256xf32>
    %29 = arith.mulf %26, %28 : vector<8x256xf32>
    %30 = arith.addf %23, %29 : vector<8x256xf32>
    %c0_21 = arith.constant 0 : index
    %c127 = arith.constant 127 : index
    %31 = vector.load %arg18[%c0_21, %c127] : memref<8x512xf32, #tpu.memory_space<vmem>>, vector<8x256xf32>
    %32 = vector.broadcast %10 : vector<1x256xf32> to vector<8x256xf32>
    %33 = arith.mulf %31, %32 : vector<8x256xf32>
    %34 = vector.extract_strided_slice %12 {offsets = [0, 3], sizes = [8, 1], strides = [1, 1]} : vector<8x9xf32> to vector<8x1xf32>
    %35 = vector.broadcast %34 : vector<8x1xf32> to vector<8x256xf32>
    %36 = arith.mulf %33, %35 : vector<8x256xf32>
    %37 = arith.addf %30, %36 : vector<8x256xf32>
    %c0_22 = arith.constant 0 : index
    %c128_23 = arith.constant 128 : index
    %38 = vector.load %arg18[%c0_22, %c128_23] : memref<8x512xf32, #tpu.memory_space<vmem>>, vector<8x256xf32>
    %39 = vector.extract_strided_slice %12 {offsets = [0, 4], sizes = [8, 1], strides = [1, 1]} : vector<8x9xf32> to vector<8x1xf32>
    %40 = vector.broadcast %39 : vector<8x1xf32> to vector<8x256xf32>
    %41 = arith.mulf %38, %40 : vector<8x256xf32>
    %42 = arith.addf %37, %41 : vector<8x256xf32>
    %c0_24 = arith.constant 0 : index
    %c129 = arith.constant 129 : index
    %43 = vector.load %arg18[%c0_24, %c129] : memref<8x512xf32, #tpu.memory_space<vmem>>, vector<8x256xf32>
    %44 = vector.broadcast %11 : vector<1x256xf32> to vector<8x256xf32>
    %45 = arith.mulf %43, %44 : vector<8x256xf32>
    %46 = vector.extract_strided_slice %12 {offsets = [0, 5], sizes = [8, 1], strides = [1, 1]} : vector<8x9xf32> to vector<8x1xf32>
    %47 = vector.broadcast %46 : vector<8x1xf32> to vector<8x256xf32>
    %48 = arith.mulf %45, %47 : vector<8x256xf32>
    %49 = arith.addf %42, %48 : vector<8x256xf32>
    %c0_25 = arith.constant 0 : index
    %c143 = arith.constant 143 : index
    %50 = vector.load %arg18[%c0_25, %c143] : memref<8x512xf32, #tpu.memory_space<vmem>>, vector<8x256xf32>
    %51 = vector.broadcast %10 : vector<1x256xf32> to vector<8x256xf32>
    %52 = arith.mulf %50, %51 : vector<8x256xf32>
    %53 = vector.extract_strided_slice %12 {offsets = [0, 6], sizes = [8, 1], strides = [1, 1]} : vector<8x9xf32> to vector<8x1xf32>
    %54 = vector.broadcast %53 : vector<8x1xf32> to vector<8x256xf32>
    %55 = arith.mulf %52, %54 : vector<8x256xf32>
    %56 = arith.addf %49, %55 : vector<8x256xf32>
    %c0_26 = arith.constant 0 : index
    %c144 = arith.constant 144 : index
    %57 = vector.load %arg18[%c0_26, %c144] : memref<8x512xf32, #tpu.memory_space<vmem>>, vector<8x256xf32>
    %58 = vector.extract_strided_slice %12 {offsets = [0, 7], sizes = [8, 1], strides = [1, 1]} : vector<8x9xf32> to vector<8x1xf32>
    %59 = vector.broadcast %58 : vector<8x1xf32> to vector<8x256xf32>
    %60 = arith.mulf %57, %59 : vector<8x256xf32>
    %61 = arith.addf %56, %60 : vector<8x256xf32>
    %c0_27 = arith.constant 0 : index
    %c145 = arith.constant 145 : index
    %62 = vector.load %arg18[%c0_27, %c145] : memref<8x512xf32, #tpu.memory_space<vmem>>, vector<8x256xf32>
    %63 = vector.broadcast %11 : vector<1x256xf32> to vector<8x256xf32>
    %64 = arith.mulf %62, %63 : vector<8x256xf32>
    %65 = vector.extract_strided_slice %12 {offsets = [0, 8], sizes = [8, 1], strides = [1, 1]} : vector<8x9xf32> to vector<8x1xf32>
    %66 = vector.broadcast %65 : vector<8x1xf32> to vector<8x256xf32>
    %67 = arith.mulf %64, %66 : vector<8x256xf32>
    %68 = arith.addf %61, %67 : vector<8x256xf32>
    %c0_28 = arith.constant 0 : index
    %c0_29 = arith.constant 0 : index
    %69 = vector.load %arg4[%c0_28, %c0_29] : memref<2x64xf32, #tpu.memory_space<vmem>>, vector<1x64xf32>
    %c1_30 = arith.constant 1 : index
    %c0_31 = arith.constant 0 : index
    %70 = vector.load %arg4[%c1_30, %c0_31] : memref<2x64xf32, #tpu.memory_space<vmem>>, vector<1x64xf32>
    %c0_32 = arith.constant 0 : index
    %c0_33 = arith.constant 0 : index
    %71 = vector.load %arg6[%c0_32, %c0_33] : memref<4x9xf32, #tpu.memory_space<vmem>>, vector<4x9xf32>
    %c0_34 = arith.constant 0 : index
    %c0_35 = arith.constant 0 : index
    %72 = vector.load %arg7[%c0_34, %c0_35] : memref<4x9xf32, #tpu.memory_space<vmem>>, vector<4x9xf32>
    %c0_36 = arith.constant 0 : index
    %c119 = arith.constant 119 : index
    %73 = vector.load %arg19[%c0_36, %c119] : memref<4x256xf32, #tpu.memory_space<vmem>>, vector<4x64xf32>
    %74 = vector.broadcast %69 : vector<1x64xf32> to vector<4x64xf32>
    %75 = arith.mulf %73, %74 : vector<4x64xf32>
    %76 = vector.extract_strided_slice %71 {offsets = [0, 0], sizes = [4, 1], strides = [1, 1]} : vector<4x9xf32> to vector<4x1xf32>
    %77 = vector.broadcast %76 : vector<4x1xf32> to vector<4x64xf32>
    %78 = arith.mulf %75, %77 : vector<4x64xf32>
    %79 = vector.extract_strided_slice %72 {offsets = [0, 0], sizes = [4, 1], strides = [1, 1]} : vector<4x9xf32> to vector<4x1xf32>
    %80 = vector.broadcast %79 : vector<4x1xf32> to vector<4x64xf32>
    %81 = arith.mulf %75, %80 : vector<4x64xf32>
    %c0_37 = arith.constant 0 : index
    %c120 = arith.constant 120 : index
    %82 = vector.load %arg19[%c0_37, %c120] : memref<4x256xf32, #tpu.memory_space<vmem>>, vector<4x64xf32>
    %83 = vector.extract_strided_slice %71 {offsets = [0, 1], sizes = [4, 1], strides = [1, 1]} : vector<4x9xf32> to vector<4x1xf32>
    %84 = vector.broadcast %83 : vector<4x1xf32> to vector<4x64xf32>
    %85 = arith.mulf %82, %84 : vector<4x64xf32>
    %86 = arith.addf %78, %85 : vector<4x64xf32>
    %87 = vector.extract_strided_slice %72 {offsets = [0, 1], sizes = [4, 1], strides = [1, 1]} : vector<4x9xf32> to vector<4x1xf32>
    %88 = vector.broadcast %87 : vector<4x1xf32> to vector<4x64xf32>
    %89 = arith.mulf %82, %88 : vector<4x64xf32>
    %90 = arith.addf %81, %89 : vector<4x64xf32>
    %c0_38 = arith.constant 0 : index
    %c121 = arith.constant 121 : index
    %91 = vector.load %arg19[%c0_38, %c121] : memref<4x256xf32, #tpu.memory_space<vmem>>, vector<4x64xf32>
    %92 = vector.broadcast %70 : vector<1x64xf32> to vector<4x64xf32>
    %93 = arith.mulf %91, %92 : vector<4x64xf32>
    %94 = vector.extract_strided_slice %71 {offsets = [0, 2], sizes = [4, 1], strides = [1, 1]} : vector<4x9xf32> to vector<4x1xf32>
    %95 = vector.broadcast %94 : vector<4x1xf32> to vector<4x64xf32>
    %96 = arith.mulf %93, %95 : vector<4x64xf32>
    %97 = arith.addf %86, %96 : vector<4x64xf32>
    %98 = vector.extract_strided_slice %72 {offsets = [0, 2], sizes = [4, 1], strides = [1, 1]} : vector<4x9xf32> to vector<4x1xf32>
    %99 = vector.broadcast %98 : vector<4x1xf32> to vector<4x64xf32>
    %100 = arith.mulf %93, %99 : vector<4x64xf32>
    %101 = arith.addf %90, %100 : vector<4x64xf32>
    %c0_39 = arith.constant 0 : index
    %c127_40 = arith.constant 127 : index
    %102 = vector.load %arg19[%c0_39, %c127_40] : memref<4x256xf32, #tpu.memory_space<vmem>>, vector<4x64xf32>
    %103 = vector.broadcast %69 : vector<1x64xf32> to vector<4x64xf32>
    %104 = arith.mulf %102, %103 : vector<4x64xf32>
    %105 = vector.extract_strided_slice %71 {offsets = [0, 3], sizes = [4, 1], strides = [1, 1]} : vector<4x9xf32> to vector<4x1xf32>
    %106 = vector.broadcast %105 : vector<4x1xf32> to vector<4x64xf32>
    %107 = arith.mulf %104, %106 : vector<4x64xf32>
    %108 = arith.addf %97, %107 : vector<4x64xf32>
    %109 = vector.extract_strided_slice %72 {offsets = [0, 3], sizes = [4, 1], strides = [1, 1]} : vector<4x9xf32> to vector<4x1xf32>
    %110 = vector.broadcast %109 : vector<4x1xf32> to vector<4x64xf32>
    %111 = arith.mulf %104, %110 : vector<4x64xf32>
    %112 = arith.addf %101, %111 : vector<4x64xf32>
    %c0_41 = arith.constant 0 : index
    %c128_42 = arith.constant 128 : index
    %113 = vector.load %arg19[%c0_41, %c128_42] : memref<4x256xf32, #tpu.memory_space<vmem>>, vector<4x64xf32>
    %114 = vector.extract_strided_slice %71 {offsets = [0, 4], sizes = [4, 1], strides = [1, 1]} : vector<4x9xf32> to vector<4x1xf32>
    %115 = vector.broadcast %114 : vector<4x1xf32> to vector<4x64xf32>
    %116 = arith.mulf %113, %115 : vector<4x64xf32>
    %117 = arith.addf %108, %116 : vector<4x64xf32>
    %118 = vector.extract_strided_slice %72 {offsets = [0, 4], sizes = [4, 1], strides = [1, 1]} : vector<4x9xf32> to vector<4x1xf32>
    %119 = vector.broadcast %118 : vector<4x1xf32> to vector<4x64xf32>
    %120 = arith.mulf %113, %119 : vector<4x64xf32>
    %121 = arith.addf %112, %120 : vector<4x64xf32>
    %c0_43 = arith.constant 0 : index
    %c129_44 = arith.constant 129 : index
    %122 = vector.load %arg19[%c0_43, %c129_44] : memref<4x256xf32, #tpu.memory_space<vmem>>, vector<4x64xf32>
    %123 = vector.broadcast %70 : vector<1x64xf32> to vector<4x64xf32>
    %124 = arith.mulf %122, %123 : vector<4x64xf32>
    %125 = vector.extract_strided_slice %71 {offsets = [0, 5], sizes = [4, 1], strides = [1, 1]} : vector<4x9xf32> to vector<4x1xf32>
    %126 = vector.broadcast %125 : vector<4x1xf32> to vector<4x64xf32>
    %127 = arith.mulf %124, %126 : vector<4x64xf32>
    %128 = arith.addf %117, %127 : vector<4x64xf32>
    %129 = vector.extract_strided_slice %72 {offsets = [0, 5], sizes = [4, 1], strides = [1, 1]} : vector<4x9xf32> to vector<4x1xf32>
    %130 = vector.broadcast %129 : vector<4x1xf32> to vector<4x64xf32>
    %131 = arith.mulf %124, %130 : vector<4x64xf32>
    %132 = arith.addf %121, %131 : vector<4x64xf32>
    %c0_45 = arith.constant 0 : index
    %c135 = arith.constant 135 : index
    %133 = vector.load %arg19[%c0_45, %c135] : memref<4x256xf32, #tpu.memory_space<vmem>>, vector<4x64xf32>
    %134 = vector.broadcast %69 : vector<1x64xf32> to vector<4x64xf32>
    %135 = arith.mulf %133, %134 : vector<4x64xf32>
    %136 = vector.extract_strided_slice %71 {offsets = [0, 6], sizes = [4, 1], strides = [1, 1]} : vector<4x9xf32> to vector<4x1xf32>
    %137 = vector.broadcast %136 : vector<4x1xf32> to vector<4x64xf32>
    %138 = arith.mulf %135, %137 : vector<4x64xf32>
    %139 = arith.addf %128, %138 : vector<4x64xf32>
    %140 = vector.extract_strided_slice %72 {offsets = [0, 6], sizes = [4, 1], strides = [1, 1]} : vector<4x9xf32> to vector<4x1xf32>
    %141 = vector.broadcast %140 : vector<4x1xf32> to vector<4x64xf32>
    %142 = arith.mulf %135, %141 : vector<4x64xf32>
    %143 = arith.addf %132, %142 : vector<4x64xf32>
    %c0_46 = arith.constant 0 : index
    %c136 = arith.constant 136 : index
    %144 = vector.load %arg19[%c0_46, %c136] : memref<4x256xf32, #tpu.memory_space<vmem>>, vector<4x64xf32>
    %145 = vector.extract_strided_slice %71 {offsets = [0, 7], sizes = [4, 1], strides = [1, 1]} : vector<4x9xf32> to vector<4x1xf32>
    %146 = vector.broadcast %145 : vector<4x1xf32> to vector<4x64xf32>
    %147 = arith.mulf %144, %146 : vector<4x64xf32>
    %148 = arith.addf %139, %147 : vector<4x64xf32>
    %149 = vector.extract_strided_slice %72 {offsets = [0, 7], sizes = [4, 1], strides = [1, 1]} : vector<4x9xf32> to vector<4x1xf32>
    %150 = vector.broadcast %149 : vector<4x1xf32> to vector<4x64xf32>
    %151 = arith.mulf %144, %150 : vector<4x64xf32>
    %152 = arith.addf %143, %151 : vector<4x64xf32>
    %c0_47 = arith.constant 0 : index
    %c137 = arith.constant 137 : index
    %153 = vector.load %arg19[%c0_47, %c137] : memref<4x256xf32, #tpu.memory_space<vmem>>, vector<4x64xf32>
    %154 = vector.broadcast %70 : vector<1x64xf32> to vector<4x64xf32>
    %155 = arith.mulf %153, %154 : vector<4x64xf32>
    %156 = vector.extract_strided_slice %71 {offsets = [0, 8], sizes = [4, 1], strides = [1, 1]} : vector<4x9xf32> to vector<4x1xf32>
    %157 = vector.broadcast %156 : vector<4x1xf32> to vector<4x64xf32>
    %158 = arith.mulf %155, %157 : vector<4x64xf32>
    %159 = arith.addf %148, %158 : vector<4x64xf32>
    %160 = vector.extract_strided_slice %72 {offsets = [0, 8], sizes = [4, 1], strides = [1, 1]} : vector<4x9xf32> to vector<4x1xf32>
    %161 = vector.broadcast %160 : vector<4x1xf32> to vector<4x64xf32>
    %162 = arith.mulf %155, %161 : vector<4x64xf32>
    %163 = arith.addf %152, %162 : vector<4x64xf32>
    %c0_48 = arith.constant 0 : index
    %c0_49 = arith.constant 0 : index
    %164 = vector.load %arg8[%c0_48, %c0_49] : memref<8x8xf32, #tpu.memory_space<vmem>>, vector<8x8xf32>
    %cst_50 = arith.constant dense<0.000000e+00> : vector<8x256xf32>
    %165 = tpu.matmul %164, %68, %cst_50 {dimension_numbers = #tpu.dot_dimension_numbers<[1], [0], [0], [1], [0, 0, 1, 1], [], []>} : vector<8x8xf32>, vector<8x256xf32>, vector<8x256xf32> -> vector<8x256xf32>
    %c0_51 = arith.constant 0 : index
    %c0_52 = arith.constant 0 : index
    %166 = vector.load %arg9[%c0_51, %c0_52] : memref<8x1xf32, #tpu.memory_space<vmem>>, vector<8x1xf32>
    %167 = vector.broadcast %166 : vector<8x1xf32> to vector<8x256xf32>
    %168 = arith.addf %165, %167 : vector<8x256xf32>
    %c0_53 = arith.constant 0 : index
    %c0_54 = arith.constant 0 : index
    %169 = vector.load %arg10[%c0_53, %c0_54] : memref<4x4xf32, #tpu.memory_space<vmem>>, vector<4x4xf32>
    %cst_55 = arith.constant dense<0.000000e+00> : vector<4x64xf32>
    %170 = tpu.matmul %169, %159, %cst_55 {dimension_numbers = #tpu.dot_dimension_numbers<[1], [0], [0], [1], [0, 0, 1, 1], [], []>} : vector<4x4xf32>, vector<4x64xf32>, vector<4x64xf32> -> vector<4x64xf32>
    %c0_56 = arith.constant 0 : index
    %c0_57 = arith.constant 0 : index
    %171 = vector.load %arg11[%c0_56, %c0_57] : memref<4x1xf32, #tpu.memory_space<vmem>>, vector<4x1xf32>
    %172 = vector.broadcast %171 : vector<4x1xf32> to vector<4x64xf32>
    %173 = arith.addf %170, %172 : vector<4x64xf32>
    %c0_58 = arith.constant 0 : index
    %c0_59 = arith.constant 0 : index
    %174 = vector.load %arg12[%c0_58, %c0_59] : memref<4x4xf32, #tpu.memory_space<vmem>>, vector<4x4xf32>
    %cst_60 = arith.constant dense<0.000000e+00> : vector<4x64xf32>
    %175 = tpu.matmul %174, %163, %cst_60 {dimension_numbers = #tpu.dot_dimension_numbers<[1], [0], [0], [1], [0, 0, 1, 1], [], []>} : vector<4x4xf32>, vector<4x64xf32>, vector<4x64xf32> -> vector<4x64xf32>
    %c0_61 = arith.constant 0 : index
    %c0_62 = arith.constant 0 : index
    %176 = vector.load %arg13[%c0_61, %c0_62] : memref<4x1xf32, #tpu.memory_space<vmem>>, vector<4x1xf32>
    %177 = vector.broadcast %176 : vector<4x1xf32> to vector<4x64xf32>
    %178 = arith.addf %175, %177 : vector<4x64xf32>
    %c0_63 = arith.constant 0 : index
    %c0_64 = arith.constant 0 : index
    %179 = vector.load %arg14[%c0_63, %c0_64] : memref<64x256xf32, #tpu.memory_space<vmem>>, vector<64x256xf32>
    %cst_65 = arith.constant dense<0.000000e+00> : vector<4x256xf32>
    %180 = tpu.matmul %173, %179, %cst_65 {dimension_numbers = #tpu.dot_dimension_numbers<[1], [0], [0], [1], [0, 0, 1, 1], [], []>} : vector<4x64xf32>, vector<64x256xf32>, vector<4x256xf32> -> vector<4x256xf32>
    %cst_66 = arith.constant dense<0.000000e+00> : vector<8x4xf32>
    %181 = tpu.matmul %168, %180, %cst_66 {dimension_numbers = #tpu.dot_dimension_numbers<[1], [1], [0], [0], [0, 0, 1, 0], [], []>} : vector<8x256xf32>, vector<4x256xf32>, vector<8x4xf32> -> vector<8x4xf32>
    %cst_67 = arith.constant dense<0xFF800000> : vector<8xf32>
    %182 = vector.multi_reduction <maximumf>, %181, %cst_67 [1] : vector<8x4xf32> to vector<8xf32>
    %183 = vector.shape_cast %182 : vector<8xf32> to vector<8x1xf32>
    %184 = vector.broadcast %183 : vector<8x1xf32> to vector<8x4xf32>
    %185 = arith.subf %181, %184 : vector<8x4xf32>
    %186 = math.exp %185 : vector<8x4xf32>
    %cst_68 = arith.constant dense<0.000000e+00> : vector<8xf32>
    %187 = vector.multi_reduction <add>, %186, %cst_68 [1] : vector<8x4xf32> to vector<8xf32>
    %188 = vector.shape_cast %187 : vector<8xf32> to vector<8x1xf32>
    %189 = tpu.reciprocal %188 : vector<8x1xf32> -> vector<8x1xf32>
    %190 = vector.broadcast %189 : vector<8x1xf32> to vector<8x4xf32>
    %191 = arith.mulf %186, %190 : vector<8x4xf32>
    %cst_69 = arith.constant dense<0.000000e+00> : vector<8x64xf32>
    %192 = tpu.matmul %191, %178, %cst_69 {dimension_numbers = #tpu.dot_dimension_numbers<[1], [0], [0], [1], [0, 0, 1, 1], [], []>} : vector<8x4xf32>, vector<4x64xf32>, vector<8x64xf32> -> vector<8x64xf32>
    %c0_70 = arith.constant 0 : index
    %c0_71 = arith.constant 0 : index
    %193 = vector.load %arg15[%c0_70, %c0_71] : memref<4x8xf32, #tpu.memory_space<vmem>>, vector<4x8xf32>
    %cst_72 = arith.constant dense<0.000000e+00> : vector<4x64xf32>
    %194 = tpu.matmul %193, %192, %cst_72 {dimension_numbers = #tpu.dot_dimension_numbers<[1], [0], [0], [1], [0, 0, 1, 1], [], []>} : vector<4x8xf32>, vector<8x64xf32>, vector<4x64xf32> -> vector<4x64xf32>
    %c0_73 = arith.constant 0 : index
    %c0_74 = arith.constant 0 : index
    %195 = vector.load %arg16[%c0_73, %c0_74] : memref<4x1xf32, #tpu.memory_space<vmem>>, vector<4x1xf32>
    %196 = vector.broadcast %195 : vector<4x1xf32> to vector<4x64xf32>
    %197 = arith.addf %194, %196 : vector<4x64xf32>
    %c0_75 = arith.constant 0 : index
    %c0_76 = arith.constant 0 : index
    %c0_77 = arith.constant 0 : index
    %198 = vector.load %arg17[%c0_75, %c0_76, %c0_77] : memref<1x4x64xf32, #tpu.memory_space<vmem>>, vector<1x4x64xf32>
    %199 = vector.shape_cast %198 : vector<1x4x64xf32> to vector<4x64xf32>
    %200 = vector.shape_cast %197 : vector<4x64xf32> to vector<1x4x64xf32>
    tpu.vector_store %arg17[%c0_75, %c0_76, %c0_77], %200 {strides = array<i32>} : memref<1x4x64xf32, #tpu.memory_space<vmem>>, vector<1x4x64xf32>,
    return
  }
  func.func @transform_0(%arg0: i32) -> (i32, i32, i32) {
    %c0_i32 = arith.constant 0 : i32
    %c0_i32_0 = arith.constant 0 : i32
    %c0_i32_1 = arith.constant 0 : i32
    return %arg0, %c0_i32, %c0_i32_0 : i32, i32, i32
  }
  func.func @transform_1(%arg0: i32) -> (i32, i32, i32) {
    %c0_i32 = arith.constant 0 : i32
    %c0_i32_0 = arith.constant 0 : i32
    %c0_i32_1 = arith.constant 0 : i32
    return %arg0, %c0_i32, %c0_i32_0 : i32, i32, i32
  }
  func.func @transform_2(%arg0: i32) -> (i32, i32) {
    %c0_i32 = arith.constant 0 : i32
    %c0_i32_0 = arith.constant 0 : i32
    %c0_i32_1 = arith.constant 0 : i32
    return %c0_i32, %c0_i32_0 : i32, i32
  }
  func.func @transform_3(%arg0: i32) -> (i32, i32) {
    %c0_i32 = arith.constant 0 : i32
    %c0_i32_0 = arith.constant 0 : i32
    %c0_i32_1 = arith.constant 0 : i32
    return %c0_i32, %c0_i32_0 : i32, i32
  }
  func.func @transform_4(%arg0: i32) -> (i32, i32) {
    %c0_i32 = arith.constant 0 : i32
    %c0_i32_0 = arith.constant 0 : i32
    %c0_i32_1 = arith.constant 0 : i32
    return %c0_i32, %c0_i32_0 : i32, i32
  }
  func.func @transform_5(%arg0: i32) -> (i32, i32) {
    %c0_i32 = arith.constant 0 : i32
    %c0_i32_0 = arith.constant 0 : i32
    %c0_i32_1 = arith.constant 0 : i32
    return %c0_i32, %c0_i32_0 : i32, i32
  }
  func.func @transform_6(%arg0: i32) -> (i32, i32) {
    %c0_i32 = arith.constant 0 : i32
    %c0_i32_0 = arith.constant 0 : i32
    %c0_i32_1 = arith.constant 0 : i32
    return %c0_i32, %c0_i32_0 : i32, i32
  }
  func.func @transform_7(%arg0: i32) -> (i32, i32) {
    %c0_i32 = arith.constant 0 : i32
    %c0_i32_0 = arith.constant 0 : i32
    %c0_i32_1 = arith.constant 0 : i32
    return %c0_i32, %c0_i32_0 : i32, i32
  }
  func.func @transform_8(%arg0: i32) -> (i32, i32) {
    %c0_i32 = arith.constant 0 : i32
    %c0_i32_0 = arith.constant 0 : i32
    %c0_i32_1 = arith.constant 0 : i32
    return %c0_i32, %c0_i32_0 : i32, i32
  }
  func.func @transform_9(%arg0: i32) -> (i32, i32) {
    %c0_i32 = arith.constant 0 : i32
    %c0_i32_0 = arith.constant 0 : i32
    %c0_i32_1 = arith.constant 0 : i32
    return %c0_i32, %c0_i32_0 : i32, i32
  }
  func.func @transform_10(%arg0: i32) -> (i32, i32) {
    %c0_i32 = arith.constant 0 : i32
    %c0_i32_0 = arith.constant 0 : i32
    %c0_i32_1 = arith.constant 0 : i32
    return %c0_i32, %c0_i32_0 : i32, i32
  }
  func.func @transform_11(%arg0: i32) -> (i32, i32) {
    %c0_i32 = arith.constant 0 : i32
    %c0_i32_0 = arith.constant 0 : i32
    %c0_i32_1 = arith.constant 0 : i32
    return %c0_i32, %c0_i32_0 : i32, i32
  }
  func.func @transform_12(%arg0: i32) -> (i32, i32) {
    %c0_i32 = arith.constant 0 : i32
    %c0_i32_0 = arith.constant 0 : i32
    %c0_i32_1 = arith.constant 0 : i32
    return %c0_i32, %c0_i32_0 : i32, i32
  }
  func.func @transform_13(%arg0: i32) -> (i32, i32) {
    %c0_i32 = arith.constant 0 : i32
    %c0_i32_0 = arith.constant 0 : i32
    %c0_i32_1 = arith.constant 0 : i32
    return %c0_i32, %c0_i32_0 : i32, i32
  }
  func.func @transform_14(%arg0: i32) -> (i32, i32) {
    %c0_i32 = arith.constant 0 : i32
    %c0_i32_0 = arith.constant 0 : i32
    %c0_i32_1 = arith.constant 0 : i32
    return %c0_i32, %c0_i32_0 : i32, i32
  }
  func.func @transform_15(%arg0: i32) -> (i32, i32) {
    %c0_i32 = arith.constant 0 : i32
    %c0_i32_0 = arith.constant 0 : i32
    %c0_i32_1 = arith.constant 0 : i32
    return %c0_i32, %c0_i32_0 : i32, i32
  }
  func.func @transform_16(%arg0: i32) -> (i32, i32, i32) {
    %c0_i32 = arith.constant 0 : i32
    %c0_i32_0 = arith.constant 0 : i32
    %c0_i32_1 = arith.constant 0 : i32
    return %arg0, %c0_i32, %c0_i32_0 : i32, i32, i32
  }
}

</mosaic_0001>

<bundles_post_ra>
// kernel: mixres_attention_forward.1
= control target key start
LH: loop header
LB: loop body
LE: loop exit
PB: predicated region body
PF: predicated region fallthrough
CT: control target
= control target key end

     0   :  { %s2038_s21 = smov 0   ;;  %s2371_s0 = inlined_call_operand.vmem [shape: f32[2,8,256], index: 0, kind: input, shape index: {}]   ;;  %s2372_s1 = inlined_call_operand.vmem [shape: f32[2,4,64], index: 1, kind: input, shape index: {}]   ;;  %s2373_s2 = inlined_call_operand.vmem [shape: f32[2,256], index: 2, kind: input, shape index: {}]   ;;  %s2374_s3 = inlined_call_operand.vmem [shape: f32[2,64], index: 3, kind: input, shape index: {}]   ;;  %s2375_s4 = inlined_call_operand.vmem [shape: f32[8,9], index: 4, kind: input, shape index: {}]   ;;  %s2376_s5 = inlined_call_operand.vmem [shape: f32[4,9], index: 5, kind: input, shape index: {}]   ;;  %s2377_s6 = inlined_call_operand.vmem [shape: f32[4,9], index: 6, kind: input, shape index: {}]   ;;  %s2378_s7 = inlined_call_operand.vmem [shape: f32[8,8], index: 7, kind: input, shape index: {}]   ;;  %s2379_s8 = inlined_call_operand.vmem [shape: f32[8,1], index: 8, kind: input, shape index: {}]   ;;  %s2380_s9 = inlined_call_operand.vmem [shape: f32[4,4], index: 9, kind: input, shape index: {}]   ;;  %s2381_s10 = inlined_call_operand.vmem [shape: f32[4,1], index: 10, kind: input, shape index: {}]   ;;  %s2382_s11 = inlined_call_operand.vmem [shape: f32[4,4], index: 11, kind: input, shape index: {}]   ;;  %s2383_s12 = inlined_call_operand.vmem [shape: f32[4,1], index: 12, kind: input, shape index: {}]   ;;  %s2384_s13 = inlined_call_operand.vmem [shape: f32[64,256], index: 13, kind: input, shape index: {}]   ;;  %s2385_s14 = inlined_call_operand.vmem [shape: f32[4,8], index: 14, kind: input, shape index: {}]   ;;  %s2386_s15 = inlined_call_operand.vmem [shape: f32[4,1], index: 15, kind: input, shape index: {}]   ;;  %s2387_s16 = inlined_call_operand.vmem [shape: f32[2,4,64], index: 16, kind: output, shape index: {}]  }
   0x1   :  { %2397 = sst [smem:[#allocation4_spill]] %s2371_s0 }
   0x2 LB: > { %s1778_s22 = sadd.s32 4294967295, %s1922_s21   ;;  %p1782_p0 = scmp.ge.s32.totalorder %s1922_s21, 1  ;;  %s1922_s21 = sphi %s2038_s21, %s26_s21  }
   0x3   : > { %p471_p1 = scmp.lt.s32.totalorder %s1922_s21, 3 }
   0x5   : > { %p472_p2 = pnand %p1782_p0, %p471_p1 }
   0x6   : > { %v1789_v0 = vld [vmem:[%s2374_s3 + $0x1] ss:$0 sm:$0xff] (!%p472_p2)  ;;  %s1924_s27 = smov (!%p472_p2), 121   ;;  %v1925_v2 = vmov (!%p472_p2), 1   ;;  %v1926_v3 = vmov (!%p472_p2), 3   ;;  %p524_p3 = scmp.lt.s32.totalorder (!%p472_p2), %s1778_s22, 1 }
   0x7   : > { %475 = sbr.rel (%p472_p2) target bundleno = 1957 (0x7a5), region = 84  ;;  %v852_v1 = vld [vmem:[%s2376_s5] sm:$0xf] (!%p472_p2)  ;;  %909 = vrot.lane.b32.xlu1 (!%p472_p2), %v1789_v0, %s1924_s27  ;;  %1883 = vset.pattern.permute.xlu0 (!%p472_p2), %v1925_v2  ;;  %v1927_v4 = vmov (!%p472_p2), 0.0   ;;  %v1928_v5 = vmov (!%p472_p2), 2   ;;  %vm2396_vm0 = vcmask (!%p472_p2), 519168  }
   0x8   : > { %881 = vperm.xlu0 (!%p472_p2), %1883, %v852_v1   ;;  %1885 = vset.pattern.permute.xlu1 (!%p472_p2), %v1926_v3  ;;  %541 = vst [vmem:[#allocation3] sm:$0xff] (!%p472_p2), %v1927_v4  ;;  %v1788_v6 = vld [vmem:[%s2374_s3] ss:$0 sm:$0xff] (!%p472_p2)  ;;  %s1929_s19 = smov (!%p472_p2), 127   ;;  %v1930_v8 = vmov (!%p472_p2), 5   ;;  %v1931_v9 = vmov (!%p472_p2), 4  }
   0x9   : > { %1810 = vmatprep.subr.mxu1 (!%p472_p2), %v1927_v4  ;;  %1196 = vmatprep.mubr.f32.mxu0 (!%p472_p2), %v1927_v4  ;;  %v1932_v10 = vmov (!%p472_p2), 7   ;;  %v1933_v11 = vmov (!%p472_p2), 6   ;;  %s1934_s20 = smov (!%p472_p2), 7   ;;  %s1935_s23 = smov (!%p472_p2), 1   ;;  %v1936_v12 = vmov (!%p472_p2), 0   ;;  %v1937_v13 = vmov (!%p472_p2), 8  }
   0xa   : > { %s2392_s24 = smov (!%p472_p2), 9   ;;  %s2389_s25 = smov (!%p472_p2), 119   ;;  %vm912_vm1 = vcmask (!%p472_p2), 990208   ;;  %vm601_vm2 = vcmask (!%p472_p2), 1039360   ;;  %vm863_vm3 = vcmask (!%p472_p2), 973824   ;;  %vm647_vm4 = vcmask (!%p472_p2), 1031168  }
   0xb   : > { %948 = vperm.xlu1 (!%p472_p2), %1885, %v852_v1   ;;  %s1940_s26 = smov (!%p472_p2), 126   ;;  %s2391_s27 = smov (!%p472_p2), 120   ;;  %vm956_vm5 = vcmask (!%p472_p2), 982016   ;;  %vm1010_vm6 = vcmask (!%p472_p2), 965632   ;;  %vm683_vm7 = vcmask (!%p472_p2), 916480   ;;  %vm569_vm8 = vcmask (!%p472_p2), 908288  }
   0xc   : > { %1884 = vset.pattern.permute.xlu0 (!%p472_p2), %v1928_v5  ;;  %s1942_s28 = smov (!%p472_p2), 112   ;;  %s2390_s29 = smov (!%p472_p2), 118   ;;  %vm742_vm9 = vcmask (!%p472_p2), 900096   ;;  %vm1949_vm10 = vmmov (!%p472_p2), 0   ;;  %vm1216_vm11 = vcmask (!%p472_p2), 72704   ;;  %vm1222_vm12 = vcmask (!%p472_p2), 1043456  }
   0xd   : > { %917 = vperm.xlu0 (!%p472_p2), %1884, %v852_v1   ;;  %s2394_s0 = smov (!%p472_p2), 111   ;;  %s2395_s17 = smov (!%p472_p2), 110   ;;  %1812 = vmatprep.mubr.msk.f32.mxu1 (!%p472_p2), %vm1949_vm10, %v1927_v4  ;;  %vm1218_vm13 = vcmask (!%p472_p2), 31744   ;;  %vm623_vm14 = vcmask (!%p472_p2), 924672   ;;  %vm718_vm15 = vcmask (!%p472_p2), 7168  }
   0xe   : > { %s2408_s22 = smov (!%p524_p3, %s1778_s22), 1 }
   0xf   : > { %s2388_s30 = sshll.u32 %s2408_s22, 2  ;;  %941 = vrot.lane.b32.xlu1 %v1788_v6, %s1929_s19 }
  0x10   : > { %s532_s18 = scalar_lea.vmem %s2372_s1, %s2388_s30  ;;  %1887 = vset.pattern.permute.xlu1 %v1930_v8  ;;  %s1947_s30 = smov 15  }
  0x11   : > { %v546_v7 = vld [vmem:[%s532_s18] sm:$0xf]  ;;  %1886 = vset.pattern.permute.xlu0 %v1931_v9  ;;  %s1946_s18 = smov 113  }
  0x12   : > { %548 = vst.msk [vmem:[#allocation3 + $0x4] sm:$0xf] %vm2396_vm0, %v546_v7  ;;  %974 = vperm.xlu0 %1886, %v852_v1   ;;  %vm841_vm0 = vcmask 769024  }
  0x13   : > { %1002 = vperm.xlu1 %1887, %v852_v1  }
  0x16   : > { %1889 = vset.pattern.permute.xlu0 %v1932_v10 }
  0x17   : > { %1888 = vset.pattern.permute.xlu1 %v1933_v11  ;;  %1057 = vperm.xlu0 %1889, %v852_v1  }
  0x18   : > { %1032 = vperm.xlu1 %1888, %v852_v1  }
  0x19   : > { %v2082_v17 = vld [vmem:[#allocation3] sm:$0xff] }
  0x1a   : > { %v2091_v26 = vld [vmem:[#allocation3 + $0x4] sm:$0xf] }
  0x1b   : > { %1027 = vrot.lane.b32.xlu0 %v1788_v6, %s1934_s20  ;;  %v1026_v35 = vld [vmem:[#allocation3 + $0x4] sm:$0xf] }
  0x1c   : > { %997 = vrot.lane.b32.xlu1 %v1789_v0, %s1935_s23  ;;  %1891 = vset.pattern.permute.xlu0 %v1936_v12  ;;  %v2108_v42 = vld [vmem:[#allocation3 + $0x4] sm:$0xf] }
  0x1d   : > { %1890 = vset.pattern.permute.xlu1 %v1937_v13 }
  0x1f   : > { %869 = vperm.xlu0 %1891, %v852_v1  }
  0x20   : > { %1085 = vperm.xlu1 %1890, %v852_v1  }
  0x23   : > { %1893 = vset.pattern.permute.xlu0 %v1928_v5 }
  0x24   : > { %1080 = vrot.lane.b32.xlu1 %v1789_v0, %s2392_s24 }
  0x25   : > { %1892 = vset.pattern.permute.xlu1 %v1925_v2 }
  0x28   : > { %860 = vrot.lane.b32.xlu1 %v1788_v6, %s2389_s25 }
  0x79   : > { %v910_v14 = vpop.permute.xlu1 %909 }
  0x7a   : > { %v911_v15 = vrot.slane %v910_v14, 4 }
  0x7c   : > { %v913_v19 = vsel %vm912_vm1, %v911_v15, %v910_v14  ;;  %vm755_vm1 = vcmask 121856  }
  0x7d   : > { %v2087_v21 = vmul.f32 %v913_v19, %v2082_v17 }
  0x87   : > { %v882_v16 = vpop.permute.xlu0 %881 }
  0x88   : > { %v884_v18 = vmul.f32 %v882_v16, %v2082_v17 }
  0x8a   : > { %v949_v20 = vpop.permute.xlu1 %948  ;;  %886 = vrot.lane.b32.xlu1 %v884_v18, %s1929_s19 }
  0x8c   : > { %v918_v22 = vpop.permute.xlu0 %917 }
  0x8d   : > { %v920_v23 = vmul.f32 %v918_v22, %v2087_v21 }
  0x8e   : > { %v942_v24 = vpop.permute.xlu1 %941 }
  0x8f   : > { %v943_v25 = vrot.slane %v942_v24, 4  ;;  %922 = vrot.lane.b32.xlu0 %v920_v23, %s1940_s26 }
  0x91   : > { %v944_v27 = vsel %vm601_vm2, %v943_v25, %v942_v24  ;;  %v975_v28 = vpop.permute.xlu0 %974 }
  0x92   : > { %v2095_v29 = vmul.f32 %v944_v27, %v2082_v17  ;;  %v1003_v30 = vpop.permute.xlu1 %1002  ;;  %v977_v31 = vmul.f32 %v975_v28, %v2091_v26 }
  0x94   : > { %v951_v32 = vmul.f32 %v949_v20, %v2095_v29  ;;  %979 = vrot.lane.b32.xlu0 %v977_v31, %s2389_s25  ;;  %s1948_s25 = smov 17  }
  0x96   : > { %v1058_v33 = vpop.permute.xlu0 %1057  ;;  %953 = vrot.lane.b32.xlu1 %v951_v32, %s2391_s27  ;;  %v557_v32 = vlaneseq  ;;  %s1952_s27 = smov 94  }
  0x97   : > { %v1033_v34 = vpop.permute.xlu1 %1032  ;;  %v1060_v44 = vmul.f32 %v1058_v33, %v2108_v42 }
  0x9a   : > { %v1028_v36 = vpop.permute.xlu0 %1027 }
  0x9b   : > { %v2101_v37 = vmul.f32 %v1028_v36, %v1026_v35  ;;  %v998_v38 = vpop.permute.xlu1 %997 }
  0x9c   : > { %v2104_v39 = vmul.f32 %v998_v38, %v2091_v26  ;;  %v558_v38 = vshrl.u32 %v557_v32, 7 }
  0x9d   : > { %v1035_v40 = vmul.f32 %v1033_v34, %v2101_v37 }
  0x9e   : > { %v1005_v41 = vmul.f32 %v1003_v30, %v2104_v39  ;;  %v870_v50 = vpop.permute.xlu0 %869 }
  0x9f   : > { %v1086_v43 = vpop.permute.xlu1 %1085  ;;  %1037 = vrot.lane.b32.xlu0 %v1035_v40, %s1942_s28 }
  0xa0   : > { %1007 = vrot.lane.b32.xlu1 %v1005_v41, %s2390_s29  ;;  %v552_v41 = vld [vmem:[%s2375_s4] sm:$0xff]  ;;  %s1801_s29 = sshll.u32 %s2408_s22, 4 }
  0xa3   : > { %v1081_v45 = vpop.permute.xlu1 %1080 }
  0xa4   : > { %v2114_v46 = vmul.f32 %v1081_v45, %v2108_v42  ;;  %1062 = vrot.lane.b32.xlu1 %v1060_v44, %s2394_s0  ;;  %v1787_v44 = vld [vmem:[%s2373_s2 + $0x1] ss:$2 sm:$0x3]  ;;  %v559_v45 = vsub.s32 0, %v558_v38 }
  0xa6   : > { %v1088_v47 = vmul.f32 %v1086_v43, %v2114_v46  ;;  %v563_v43 = vsub.s32 1, %v558_v38 }
  0xa7   : > { %v861_v48 = vpop.permute.xlu1 %860 }
  0xa8   : > { %1090 = vrot.lane.b32.xlu0 %v1088_v47, %s2395_s17  ;;  %v862_v49 = vrot.slane %v861_v48, 4  ;;  %v618_v47 = vrot.slane %v1787_v44, %v563_v43 }
  0xaa   : > { %v864_v51 = vsel %vm863_vm3, %v862_v49, %v861_v48  ;;  %v549_v48 = vld [vmem:[%s2373_s2] ss:$2 sm:$0x3]  ;;  %v614_v49 = vrot.slane %v1787_v44, %v559_v45 }
  0xab   : > { %v2121_v53 = vmul.f32 %v2082_v17, %v864_v51  ;;  %v564_v51 = vrot.slane %v549_v48, %v563_v43 }
  0xad   : > { %v872_v56 = vmul.f32 %v870_v50, %v2121_v53  ;;  %v560_v50 = vrot.slane %v549_v48, %v559_v45 }
  0xfc   : > { %v887_v52 = vpop.permute.xlu1 %886 }
  0xfd   : > { %v888_v54 = vrot.slane %v887_v52, 4 }
  0xff   : > { %v889_v57 = vsel %vm601_vm2, %v887_v52, %v888_v54 }
 0x100   : > { %v891_v61 = vadd.f32 %v889_v57, %v872_v56 }
 0x101   : > { %v923_v55 = vpop.permute.xlu0 %922 }
 0x102   : > { %v924_v58 = vrot.slane %v923_v55, 4 }
 0x104   : > { %v925_v63 = vsel %vm647_vm4, %v923_v55, %v924_v58 }
 0x105   : > { %v927_v6 = vadd.f32 %v925_v63, %v891_v61 }
 0x106   : > { %v980_v62 = vpop.permute.xlu0 %979 }
 0x107   : > { %v981_v1 = vrot.slane %v980_v62, 4 }
 0x108   : > { %v954_v59 = vpop.permute.xlu1 %953 }
 0x109   : > { %v955_v60 = vrot.slane %v954_v59, 4  ;;  %v982_v14 = vsel %vm863_vm3, %v981_v1, %v980_v62 }
 0x10b   : > { %v957_v0 = vsel %vm956_vm5, %v954_v59, %v955_v60 }
 0x10c   : > { %v959_v7 = vadd.f32 %v957_v0, %v927_v6 }
 0x10e   : > { %v984_v20 = vadd.f32 %v982_v14, %v959_v7 }
 0x111   : > { %v1038_v15 = vpop.permute.xlu0 %1037 }
 0x112   : > { %v1008_v16 = vpop.permute.xlu1 %1007  ;;  %v1039_v18 = vrot.slane %v1038_v15, 4 }
 0x113   : > { %v1009_v19 = vrot.slane %v1008_v16, 4 }
 0x114   : > { %v1040_v25 = vsel %vm683_vm7, %v1039_v18, %v1038_v15 }
 0x115   : > { %v1011_v22 = vsel %vm1010_vm6, %v1009_v19, %v1008_v16 }
 0x116   : > { %v1013_v23 = vadd.f32 %v1011_v22, %v984_v20  ;;  %v1063_v24 = vpop.permute.xlu1 %1062 }
 0x117   : > { %v1064_v27 = vrot.slane %v1063_v24, 4 }
 0x118   : > { %v1042_v28 = vadd.f32 %v1040_v25, %v1013_v23 }
 0x119   : > { %v1065_v30 = vsel %vm569_vm8, %v1064_v27, %v1063_v24 }
 0x11a   : > { %v1091_v31 = vpop.permute.xlu0 %1090  ;;  %v1067_v34 = vadd.f32 %v1065_v30, %v1042_v28 }
 0x11b   : > { %v1092_v33 = vrot.slane %v1091_v31, 4 }
 0x11d   : > { %v1093_v35 = vsel %vm742_vm9, %v1092_v33, %v1091_v31 }
 0x11e   : > { %v1095_v36 = vadd.f32 %v1093_v35, %v1067_v34 }
 0x120   : > { %1212 = vrot.lane.b32.xlu1 %v1095_v36, %s2392_s24  ;;  %v1211_v40 = vcombine.high %v1095_v36, %v1095_v36 }
 0x122   : > { %1214 = vrot.lane.b32.xlu0 %v1211_v40, %s2392_s24 }
 0x124   : > { %586 = vperm.xlu1 %1892, %v552_v41  }
 0x126   : > { %632 = vperm.xlu0 %1893, %v552_v41  }
 0x128   : > { %1894 = vset.pattern.permute.xlu1 %v1926_v3 }
 0x129   : > { %668 = vperm.xlu1 %1894, %v552_v41  }
 0x12a   : > { %621 = vrot.lane.b32.xlu0 %v618_v47, %s1946_s18 }
 0x12b   : > { %1896 = vset.pattern.permute.xlu0 %v1930_v8 }
 0x12d   : > { %619 = vrot.lane.b32.xlu1 %v614_v49, %s1946_s18 }
 0x12e   : > { %656 = vrot.lane.b32.xlu0 %v560_v50, %s1929_s19  ;;  %1895 = vset.pattern.permute.xlu1 %v1931_v9 }
 0x131   : > { %693 = vperm.xlu1 %1895, %v552_v41  }
 0x132   : > { %727 = vperm.xlu0 %1896, %v552_v41  }
 0x135   : > { %658 = vrot.lane.b32.xlu1 %v564_v51, %s1929_s19 }
 0x136   : > { %1897 = vset.pattern.permute.xlu1 %v1933_v11  ;;  %716 = vrot.lane.b32.xlu0 %v618_v47, %s1935_s23 }
 0x137   : > { %1899 = vset.pattern.permute.xlu0 %v1937_v13 }
 0x139   : > { %764 = vperm.xlu1 %1897, %v552_v41  }
 0x13a   : > { %751 = vrot.lane.b32.xlu0 %v560_v50, %s1947_s30 }
 0x13d   : > { %714 = vrot.lane.b32.xlu1 %v614_v49, %s1935_s23  ;;  %s1951_s23 = smov 95  }
 0x13e   : > { %1898 = vset.pattern.permute.xlu1 %v1932_v10  ;;  %826 = vperm.xlu0 %1899, %v552_v41  }
 0x141   : > { %789 = vperm.xlu1 %1898, %v552_v41  }
 0x142   : > { %1900 = vset.pattern.permute.xlu0 %v1936_v12 }
 0x143   : > { %579 = vperm.xlu0 %1900, %v552_v41  }
 0x145   : > { %753 = vrot.lane.b32.xlu1 %v564_v51, %s1947_s30  ;;  %s2398_s30 = sld [smem:[#allocation4_spill]] }
 0x146   : > { %1901 = vset.pattern.permute.xlu1 %v1936_v12 }
 0x147   : > { %1903 = vset.pattern.permute.xlu0 %v1928_v5  ;;  %v1203_v5 = vld [vmem:[%s2380_s9] sm:$0xf] }
 0x149   : > { %813 = vrot.lane.b32.xlu1 %v614_v49, %s1948_s25 }
 0x14b   : > { %s528_s24 = scalar_lea.vmem %s2398_s30, %s1801_s29 }
 0x14c   : > { %v2173_v56 = vld [vmem:[%s528_s24] sm:$0xff]  ;;  %v2175_v57 = vld [vmem:[%s528_s24 + $0x8] sm:$0xff]  ;;  %s1950_s24 = smov 96  }
 0x14d   : > { %815 = vrot.lane.b32.xlu1 %v618_v47, %s1948_s25 }
 0x151   : > { %565 = vrot.lane.b32.xlu1 %v560_v50, %s2394_s0 }
 0x155   : > { %567 = vrot.lane.b32.xlu1 %v564_v51, %s2394_s0 }
 0x192   : > { %v1213_v52 = vpop.permute.xlu1 %1212 }
 0x194   : > { %v1215_v54 = vpop.permute.xlu0 %1214 }
 0x195   : > { %v1217_v55 = vsel %vm1216_vm11, %v1213_v52, %v1215_v54 }
 0x196   : > { %1811 = vmatpush3.msk.msra.mxu1 %vm1222_vm12, %v1217_v55 }
 0x197   : > { %1813 = vmatmul.mubr.msk.f32.vlgmr.msra.gmra.mrb[0].mxu1 %vm1218_vm13, %v1203_v5 }
 0x198   : > { %1468 = vmatprep.mubr.f32.mxu1 %v1927_v4 }
 0x1a3   : > { %v587_v58 = vpop.permute.xlu1 %586 }
 0x1a4   : > { %v590_v59 = vmul.f32 %v587_v58, %v2173_v56  ;;  %v591_v60 = vmul.f32 %v587_v58, %v2175_v57  ;;  %v589_v62 = vmul.f32 0.0, %v587_v58 }
 0x1a5   : > { %v633_v61 = vpop.permute.xlu0 %632 }
 0x1a6   : > { %599 = vrot.lane.b32.xlu1 %v591_v60, %s1929_s19  ;;  %597 = vrot.lane.b32.xlu0 %v590_v59, %s1929_s19 }
 0x1a8   : > { %v669_v63 = vpop.permute.xlu1 %668 }
 0x1a9   : > { %v622_v0 = vpop.permute.xlu0 %621 }
 0x1aa   : > { %v630_v1 = vmul.f32 %v622_v0, %v2175_v57  ;;  %595 = vrot.lane.b32.xlu0 %v589_v62, %s1929_s19 }
 0x1ac   : > { %v637_v6 = vmul.f32 %v633_v61, %v630_v1  ;;  %v620_v7 = vpop.permute.xlu1 %619 }
 0x1ad   : > { %v624_v14 = vsel %vm623_vm14, %v620_v7, %v622_v0  ;;  %v657_v16 = vpop.permute.xlu0 %656  ;;  %v628_v18 = vmul.f32 0.0, %v620_v7  ;;  %vm817_vm14 = vcmask 138240  }
 0x1ae   : > { %v629_v15 = vmul.f32 %v624_v14, %v2173_v56  ;;  %645 = vrot.lane.b32.xlu0 %v637_v6, %s1940_s26  ;;  %v664_v31 = vmul.f32 0.0, %v657_v16 }
 0x1af   : > { %v635_v22 = vmul.f32 %v633_v61, %v628_v18 }
 0x1b0   : > { %v694_v19 = vpop.permute.xlu1 %693  ;;  %v636_v20 = vmul.f32 %v633_v61, %v629_v15  ;;  %v671_v35 = vmul.f32 %v669_v63, %v664_v31 }
 0x1b1   : > { %v728_v24 = vpop.permute.xlu0 %727  ;;  %v696_v36 = vmul.f32 %v694_v19, %v2173_v56  ;;  %v697_v44 = vmul.f32 %v694_v19, %v2175_v57 }
 0x1b2   : > { %643 = vrot.lane.b32.xlu1 %v636_v20, %s1940_s26 }
 0x1b4   : > { %v659_v23 = vpop.permute.xlu1 %658 }
 0x1b5   : > { %v660_v25 = vsel %vm601_vm2, %v657_v16, %v659_v23  ;;  %v666_v27 = vmul.f32 %v659_v23, %v2175_v57  ;;  %v717_v34 = vpop.permute.xlu0 %716 }
 0x1b6   : > { %v665_v28 = vmul.f32 %v660_v25, %v2173_v56  ;;  %641 = vrot.lane.b32.xlu1 %v635_v22, %s1940_s26  ;;  %v725_v45 = vmul.f32 0.0, %v717_v34  ;;  %v1204_v22 = vld [vmem:[%s2381_s10] sm:$0xf]  ;;  %v1387_v25 = vld [vmem:[%s2384_s13 + $0x18] sm:$0xff] }
 0x1b7   : > { %v673_v30 = vmul.f32 %v669_v63, %v666_v27  ;;  %v1384_v27 = vld [vmem:[%s2384_s13] sm:$0xff] }
 0x1b8   : > { %v765_v32 = vpop.permute.xlu1 %764  ;;  %v672_v33 = vmul.f32 %v669_v63, %v665_v28  ;;  %v732_v50 = vmul.f32 %v728_v24, %v725_v45 }
 0x1b9   : > { %v752_v49 = vpop.permute.xlu0 %751 }
 0x1ba   : > { %681 = vrot.lane.b32.xlu1 %v673_v30, %s1942_s28  ;;  %679 = vrot.lane.b32.xlu0 %v672_v33, %s1942_s28  ;;  %v760_v51 = vmul.f32 %v752_v49, %v2173_v56  ;;  %v1386_v30 = vld [vmem:[%s2384_s13 + $0x10] sm:$0xff] }
 0x1bb   : > { %v1832_v31 = vpack.c.bf16 %v1386_v30, %v1384_v27 }
 0x1bc   : > { %v715_v38 = vpop.permute.xlu1 %714  ;;  %v767_v58 = vmul.f32 %v765_v32, %v760_v51 }
 0x1bd   : > { %v719_v40 = vsel %vm718_vm15, %v715_v38, %v717_v34  ;;  %v723_v41 = vmul.f32 %v715_v38, %v2173_v56  ;;  %v827_v14 = vpop.permute.xlu0 %826  ;;  %vm779_vm15 = vcmask 785408  }
 0x1be   : > { %700 = vrot.lane.b32.xlu1 %v696_v36, %s2394_s0  ;;  %677 = vrot.lane.b32.xlu0 %v671_v35, %s1942_s28  ;;  %v724_v47 = vmul.f32 %v719_v40, %v2175_v57 }
 0x1bf   : > { %v730_v43 = vmul.f32 %v728_v24, %v723_v41 }
 0x1c0   : > { %v790_v48 = vpop.permute.xlu1 %789  ;;  %v731_v54 = vmul.f32 %v728_v24, %v724_v47  ;;  %v1385_v24 = vld [vmem:[%s2384_s13 + $0x8] sm:$0xff] }
 0x1c1   : > { %v792_v62 = vmul.f32 %v790_v48, %v2173_v56  ;;  %v793_v15 = vmul.f32 %v790_v48, %v2175_v57  ;;  %v794_v16 = vmul.f32 0.0, %v790_v48  ;;  %v1830_v28 = vpack.c.bf16 %v1387_v25, %v1385_v24  ;;  %v1390_v24 = vld [vmem:[%s2384_s13 + $0x30] sm:$0xff] }
 0x1c2   : > { %736 = vrot.lane.b32.xlu1 %v730_v43, %s2395_s17  ;;  %702 = vrot.lane.b32.xlu0 %v697_v44, %s2394_s0  ;;  %s2399_s0 = smov 120  }
 0x1c3   : > { %1831 = vmatprep.subr.bf16.mxu1 %v1830_v28 }
 0x1c4   : > { %v754_v52 = vpop.permute.xlu1 %753  ;;  %1833 = vmatpush1.bf16.msra.mxu1 %v1832_v31 }
 0x1c5   : > { %v756_v5 = vsel %vm755_vm1, %v752_v49, %v754_v52  ;;  %v762_v59 = vmul.f32 0.0, %v754_v52  ;;  %vm804_vm1 = vcmask 777216  }
 0x1c6   : > { %v761_v55 = vmul.f32 %v756_v5, %v2175_v57  ;;  %740 = vrot.lane.b32.xlu1 %v732_v50, %s2395_s17  ;;  %738 = vrot.lane.b32.xlu0 %v731_v54, %s2395_s17  ;;  %s2400_s17 = smov 118  }
 0x1c7   : > { %v769_v63 = vmul.f32 %v765_v32, %v762_v59 }
 0x1c8   : > { %v768_v60 = vmul.f32 %v765_v32, %v761_v55  ;;  %v814_v61 = vpop.permute.xlu1 %813  ;;  %v580_v32 = vpop.permute.xlu0 %579 }
 0x1c9   : > { %v822_v6 = vmul.f32 %v814_v61, %v2173_v56 }
 0x1ca   : > { %775 = vrot.lane.b32.xlu1 %v768_v60, %s1950_s24  ;;  %773 = vrot.lane.b32.xlu0 %v767_v58, %s1950_s24 }
 0x1cb   : > { %v829_v18 = vmul.f32 %v827_v14, %v822_v6 }
 0x1cc   : > { %v816_v0 = vpop.permute.xlu1 %815 }
 0x1cd   : > { %v818_v1 = vsel %vm817_vm14, %v814_v61, %v816_v0  ;;  %v824_v20 = vmul.f32 0.0, %v816_v0 }
 0x1ce   : > { %798 = vrot.lane.b32.xlu1 %v792_v62, %s1951_s23  ;;  %777 = vrot.lane.b32.xlu0 %v769_v63, %s1950_s24  ;;  %v823_v7 = vmul.f32 %v818_v1, %v2175_v57 }
 0x1cf   : > { %v831_v23 = vmul.f32 %v827_v14, %v824_v20  ;;  %v1388_v20 = vld [vmem:[%s2384_s13 + $0x20] sm:$0xff] }
 0x1d0   : > { %v830_v19 = vmul.f32 %v827_v14, %v823_v7 }
 0x1d2   : > { %802 = vrot.lane.b32.xlu1 %v794_v16, %s1951_s23  ;;  %800 = vrot.lane.b32.xlu0 %v793_v15, %s1951_s23 }
 0x1d6   : > { %837 = vrot.lane.b32.xlu1 %v830_v19, %s1952_s27  ;;  %835 = vrot.lane.b32.xlu0 %v829_v18, %s1952_s27  ;;  %v1389_v18 = vld [vmem:[%s2384_s13 + $0x28] sm:$0xff]  ;;  %v1391_v19 = vld [vmem:[%s2384_s13 + $0x38] sm:$0xff] }
 0x1da   : > { %839 = vrot.lane.b32.xlu0 %v831_v23, %s1952_s27  ;;  %1207 = vperm.xlu1 %1901, %v1204_v22   ;;  %v1834_v23 = vpack.c.bf16 %v1391_v19, %v1389_v18  ;;  %s2401_s27 = smov 119  }
 0x1dc   : > { %1835 = vmatprep.subr.bf16.mxu1 %v1834_v23 }
 0x1de   : > { %1902 = vset.pattern.permute.xlu1 %v1925_v2  ;;  %v566_v2 = vpop.permute.xlu1 %565 }
 0x1df   : > { %v574_v49 = vmul.f32 0.0, %v566_v2 }
 0x1e1   : > { %v582_v5 = vmul.f32 %v580_v32, %v574_v49 }
 0x1e2   : > { %v568_v33 = vpop.permute.xlu1 %567 }
 0x1e3   : > { %v570_v48 = vsel %vm569_vm8, %v566_v2, %v568_v33  ;;  %v576_v54 = vmul.f32 %v568_v33, %v2175_v57  ;;  %v1836_v2 = vpack.c.bf16 %v1390_v24, %v1388_v20 }
 0x1e4   : > { %v575_v50 = vmul.f32 %v570_v48, %v2173_v56 }
 0x1e5   : > { %v584_v0 = vmul.f32 %v580_v32, %v576_v54  ;;  %1837 = vmatpush1.bf16.msra.mxu1 %v1836_v2 }
 0x1e6   : > { %v583_v55 = vmul.f32 %v580_v32, %v575_v50 }
 0x218   : > { %v598_v34 = vpop.permute.xlu0 %597  ;;  %v600_v35 = vpop.permute.xlu1 %599 }
 0x219   : > { %v603_v60 = vsel %vm601_vm2, %v598_v34, %v600_v35  ;;  %v609_v25 = vadd.f32 %v600_v35, %v584_v0  ;;  %v1395_v35 = vld [vmem:[%s2384_s13 + $0x58] sm:$0xff] }
 0x21a   : > { %v608_v1 = vadd.f32 %v603_v60, %v583_v55 }
 0x21c   : > { %v596_v36 = vpop.permute.xlu0 %595 }
 0x21d   : > { %v602_v61 = vsel %vm601_vm2, %v596_v36, %v598_v34  ;;  %v1393_v36 = vld [vmem:[%s2384_s13 + $0x48] sm:$0xff] }
 0x21e   : > { %v607_v56 = vadd.f32 %v602_v61, %v582_v5  ;;  %v1397_v61 = vld [vmem:[%s2384_s13 + $0x68] sm:$0xff] }
 0x220   : > { %v646_v40 = vpop.permute.xlu0 %645 }
 0x221   : > { %v655_v33 = vadd.f32 %v646_v40, %v609_v25 }
 0x224   : > { %v644_v38 = vpop.permute.xlu1 %643 }
 0x225   : > { %v649_v62 = vsel %vm647_vm4, %v644_v38, %v646_v40  ;;  %v1394_v40 = vld [vmem:[%s2384_s13 + $0x50] sm:$0xff] }
 0x226   : > { %v654_v15 = vadd.f32 %v649_v62, %v608_v1  ;;  %v1399_v62 = vld [vmem:[%s2384_s13 + $0x78] sm:$0xff] }
 0x228   : > { %v642_v41 = vpop.permute.xlu1 %641 }
 0x229   : > { %v648_v63 = vsel %vm647_vm4, %v642_v41, %v644_v38  ;;  %v1838_v41 = vpack.c.bf16 %v1395_v35, %v1393_v36 }
 0x22a   : > { %v653_v16 = vadd.f32 %v648_v63, %v607_v56 }
 0x22b   : > { %1839 = vmatprep.subr.bf16.mxu1 %v1838_v41 }
 0x22c   : > { %v682_v43 = vpop.permute.xlu1 %681  ;;  %v680_v44 = vpop.permute.xlu0 %679 }
 0x22d   : > { %v685_v14 = vsel %vm683_vm7, %v680_v44, %v682_v43 }
 0x22e   : > { %v690_v27 = vadd.f32 %v685_v14, %v654_v15 }
 0x230   : > { %v701_v45 = vpop.permute.xlu1 %700  ;;  %v678_v47 = vpop.permute.xlu0 %677 }
 0x231   : > { %v684_v57 = vsel %vm683_vm7, %v678_v47, %v680_v44  ;;  %v1392_v44 = vld [vmem:[%s2384_s13 + $0x40] sm:$0xff]  ;;  %v691_v47 = vadd.f32 %v682_v43, %v655_v33 }
 0x232   : > { %v689_v28 = vadd.f32 %v684_v57, %v653_v16  ;;  %v1840_v5 = vpack.c.bf16 %v1394_v40, %v1392_v44  ;;  %v1396_v43 = vld [vmem:[%s2384_s13 + $0x60] sm:$0xff] }
 0x234   : > { %v2227_v51 = vpop.permute.xlu1 %736  ;;  %v703_v52 = vpop.permute.xlu0 %702  ;;  %v708_v48 = vadd.f32 %v701_v45, %v689_v28  ;;  %1841 = vmatpush1.bf16.msra.mxu1 %v1840_v5 }
 0x235   : > { %v704_v22 = vsel %vm569_vm8, %v701_v45, %v703_v52  ;;  %v710_v45 = vadd.f32 %v703_v52, %v691_v47 }
 0x236   : > { %v709_v34 = vadd.f32 %v704_v22, %v690_v27  ;;  %v748_v56 = vadd.f32 %v2227_v51, %v708_v48 }
 0x238   : > { %v741_v58 = vpop.permute.xlu1 %740  ;;  %v739_v59 = vpop.permute.xlu0 %738 }
 0x239   : > { %v743_v32 = vsel %vm742_vm9, %v2227_v51, %v739_v59  ;;  %v744_v55 = vsel %vm742_vm9, %v739_v59, %v741_v58  ;;  %v1842_v58 = vpack.c.bf16 %v1399_v62, %v1397_v61  ;;  %v1398_v59 = vld [vmem:[%s2384_s13 + $0x70] sm:$0xff] }
 0x23a   : > { %v749_v49 = vadd.f32 %v743_v32, %v709_v34  ;;  %v1844_v1 = vpack.c.bf16 %v1398_v59, %v1396_v43  ;;  %v750_v14 = vadd.f32 %v744_v55, %v710_v45 }
 0x23b   : > { %1843 = vmatprep.subr.bf16.mxu1 %v1842_v58 }
 0x23c   : > { %v776_v6 = vpop.permute.xlu1 %775  ;;  %v774_v7 = vpop.permute.xlu0 %773  ;;  %1845 = vmatpush1.bf16.msra.mxu1 %v1844_v1 }
 0x23d   : > { %v780_v38 = vsel %vm779_vm15, %v774_v7, %v776_v6  ;;  %v785_v19 = vadd.f32 %v774_v7, %v748_v56  ;;  %v853_v7 = vld [vmem:[%s2377_s6] sm:$0xf] }
 0x23e   : > { %v786_v63 = vadd.f32 %v780_v38, %v749_v49 }
 0x240   : > { %v799_v30 = vpop.permute.xlu1 %798  ;;  %v778_v31 = vpop.permute.xlu0 %777 }
 0x241   : > { %v781_v0 = vsel %vm779_vm15, %v776_v6, %v778_v31  ;;  %v810_v23 = vadd.f32 %v799_v30, %v785_v19  ;;  %vm1128_vm15 = vcmask 64512  }
 0x242   : > { %v787_v20 = vadd.f32 %v781_v0, %v750_v14 }
 0x244   : > { %v803_v50 = vpop.permute.xlu1 %802  ;;  %v801_v54 = vpop.permute.xlu0 %800 }
 0x245   : > { %v805_v60 = vsel %vm804_vm1, %v799_v30, %v801_v54  ;;  %v806_v52 = vsel %vm804_vm1, %v801_v54, %v803_v50 }
 0x246   : > { %v811_v57 = vadd.f32 %v805_v60, %v786_v63  ;;  %v812_v24 = vadd.f32 %v806_v52, %v787_v20 }
 0x248   : > { %v838_v15 = vpop.permute.xlu1 %837  ;;  %v836_v16 = vpop.permute.xlu0 %835 }
 0x249   : > { %v842_v18 = vsel %vm841_vm0, %v836_v16, %v838_v15  ;;  %v847_v6 = vadd.f32 %v836_v16, %v810_v23 }
 0x24a   : > { %v848_v22 = vadd.f32 %v842_v18, %v811_v57 }
 0x24c   : > { %v840_v25 = vpop.permute.xlu0 %839  ;;  %1120 = vrot.lane.b32.xlu0 %v848_v22, %s1948_s25 }
 0x24d   : > { %v843_v51 = vsel %vm841_vm0, %v838_v15, %v840_v25  ;;  %vm1400_vm0 = vcmask 523264  }
 0x24e   : > { %v849_v27 = vadd.f32 %v843_v51, %v812_v24 }
 0x250   : > { %1122 = vrot.lane.b32.xlu1 %v849_v27, %s1948_s25  ;;  %1118 = vrot.lane.b32.xlu0 %v847_v6, %s1948_s25 }
 0x254   : > { %893 = vperm.xlu1 %1902, %v853_v7   ;;  %929 = vperm.xlu0 %1903, %v853_v7  }
 0x258   : > { %1904 = vset.pattern.permute.xlu1 %v1926_v3  ;;  %1906 = vset.pattern.permute.xlu0 %v1930_v8 }
 0x259   : > { %961 = vperm.xlu1 %1904, %v853_v7   ;;  %1015 = vperm.xlu0 %1906, %v853_v7   ;;  %v1208_v28 = vpop.permute.xlu1 %1207 }
 0x25d   : > { %1905 = vset.pattern.permute.xlu1 %v1931_v9  ;;  %1909 = vset.pattern.permute.xlu0 %v1937_v13 }
 0x25e   : > { %986 = vperm.xlu1 %1905, %v853_v7   ;;  %1097 = vperm.xlu0 %1909, %v853_v7  }
 0x262   : > { %1907 = vset.pattern.permute.xlu1 %v1933_v11  ;;  %1911 = vset.pattern.permute.xlu0 %v1936_v12 }
 0x263   : > { %1044 = vperm.xlu1 %1907, %v853_v7  }
 0x267   : > { %1908 = vset.pattern.permute.xlu1 %v1932_v10  ;;  %v1108_v10 = vld [vmem:[%s2378_s7] sm:$0xff] }
 0x268   : > { %1069 = vperm.xlu1 %1908, %v853_v7  }
 0x26a   : > { %v1291_v3 = vpop.f32.mrb[0].mxu1 }
 0x26b   : > { %v1292_v8 = vadd.f32 %v1291_v3, %v1208_v28  ;;  %v1814_v30 = vpop.f32.mrb[1].mxu1  ;;  %v1109_v28 = vld [vmem:[%s2379_s8] sm:$0xff] }
 0x26c   : > { %1910 = vset.pattern.permute.xlu1 %v1936_v12 }
 0x26d   : > { %875 = vperm.xlu1 %1910, %v853_v7   ;;  %1795 = vmatmul.mubr.msk.f32.vlgmr.msra.gmra.mrb[2].mxu1 %vm1400_vm0, %v1292_v8 }
 0x2be   : > { %v1121_v9 = vpop.permute.xlu0 %1120 }
 0x2c2   : > { %v1123_v13 = vpop.permute.xlu1 %1122  ;;  %v1119_v31 = vpop.permute.xlu0 %1118 }
 0x2c3   : > { %v1125_v11 = vsel %vm817_vm14, %v1121_v9, %v1123_v13  ;;  %v1124_v2 = vsel %vm817_vm14, %v1119_v31, %v1121_v9  ;;  %v1295_v13 = vld [vmem:[%s2382_s11] sm:$0xf] }
 0x2c4   : > { %1132 = vmatprep.subr.mxu0 %v1125_v11 }
 0x2c5   : > { %1133 = vmatpush1.msra.mxu0 %v1124_v2 }
 0x2c6   : > { %1790 = vmatmul.mubr.msk.f32.vlgmr.msra.gmra.mrb[0].mxu0 %vm1128_vm15, %v1108_v10  ;;  %1815 = vmatprep.subr.mxu0 %v1927_v4 }
 0x2c7   : > { %1817 = vmatprep.mubr.msk.f32.mxu0 %vm1949_vm10, %v1927_v4 }
 0x2d3   : > { %v894_v12 = vpop.permute.xlu1 %893  ;;  %v930_v32 = vpop.permute.xlu0 %929 }
 0x2d4   : > { %v896_v33 = vmul.f32 %v894_v12, %v2082_v17  ;;  %v932_v34 = vmul.f32 %v930_v32, %v2087_v21 }
 0x2d6   : > { %898 = vrot.lane.b32.xlu1 %v896_v33, %s1929_s19  ;;  %934 = vrot.lane.b32.xlu0 %v932_v34, %s1940_s26  ;;  %s2402_s19 = smov 110   ;;  %s2403_s26 = smov 111  }
 0x2d8   : > { %v962_v36 = vpop.permute.xlu1 %961  ;;  %v1016_v38 = vpop.permute.xlu0 %1015 }
 0x2d9   : > { %v964_v35 = vmul.f32 %v962_v36, %v2095_v29  ;;  %v1018_v41 = vmul.f32 %v1016_v38, %v2104_v39 }
 0x2db   : > { %966 = vrot.lane.b32.xlu1 %v964_v35, %s2399_s0  ;;  %v1296_v35 = vld [vmem:[%s2383_s12] sm:$0xf] }
 0x2dd   : > { %v987_v44 = vpop.permute.xlu1 %986  ;;  %v1098_v47 = vpop.permute.xlu0 %1097 }
 0x2de   : > { %v989_v40 = vmul.f32 %v987_v44, %v2091_v26  ;;  %v1100_v29 = vmul.f32 %v1098_v47, %v2114_v46 }
 0x2df   : > { %1020 = vrot.lane.b32.xlu1 %v1018_v41, %s2400_s17 }
 0x2e0   : > { %991 = vrot.lane.b32.xlu0 %v989_v40, %s2401_s27 }
 0x2e2   : > { %v1045_v17 = vpop.permute.xlu1 %1044 }
 0x2e3   : > { %v1047_v21 = vmul.f32 %v1045_v17, %v2101_v37 }
 0x2e5   : > { %1049 = vrot.lane.b32.xlu0 %v1047_v21, %s1942_s28  ;;  %s2404_s28 = smov 9  }
 0x2e7   : > { %v1070_v48 = vpop.permute.xlu1 %1069 }
 0x2e8   : > { %v1072_v49 = vmul.f32 %v1070_v48, %v2108_v42 }
 0x2e9   : > { %1102 = vrot.lane.b32.xlu0 %v1100_v29, %s2402_s19  ;;  %v1633_v29 = vld [vmem:[%s2386_s15] sm:$0xf]  ;;  %s2405_s19 = sshll.u32 %s2408_s22, 2 }
 0x2ea   : > { %1074 = vrot.lane.b32.xlu1 %v1072_v49, %s2403_s26  ;;  %s536_s18 = scalar_lea.vmem %s2387_s16, %s2405_s19 }
 0x2ec   : > { %v876_v50 = vpop.permute.xlu1 %875 }
 0x2ed   : > { %v878_v37 = vmul.f32 %v876_v50, %v2121_v53 }
 0x340   : > { %v1470_v26 = vpop.f32.mrb[2].mxu1 }
 0x341   : > { %v1472_v39 = vpop.f32.mrb[3].mxu1 }
 0x348   : > { %v899_v54 = vpop.permute.xlu1 %898  ;;  %v935_v5 = vpop.permute.xlu0 %934 }
 0x349   : > { %v900_v55 = vrot.slane %v899_v54, 4  ;;  %v936_v61 = vrot.slane %v935_v5, 4 }
 0x34b   : > { %v901_v60 = vsel %vm601_vm2, %v899_v54, %v900_v55  ;;  %v937_v42 = vsel %vm647_vm4, %v935_v5, %v936_v61  ;;  %vm2406_vm2 = vcmask 519168  }
 0x34c   : > { %v903_v62 = vadd.f32 %v901_v60, %v878_v37 }
 0x34d   : > { %v967_v46 = vpop.permute.xlu1 %966 }
 0x34e   : > { %v968_v43 = vrot.slane %v967_v46, 4  ;;  %v939_v45 = vadd.f32 %v937_v42, %v903_v62 }
 0x350   : > { %v969_v63 = vsel %vm956_vm5, %v967_v46, %v968_v43 }
 0x351   : > { %v1021_v58 = vpop.permute.xlu1 %1020  ;;  %v971_v1 = vadd.f32 %v969_v63, %v939_v45 }
 0x352   : > { %v992_v59 = vpop.permute.xlu0 %991  ;;  %v1022_v56 = vrot.slane %v1021_v58, 4 }
 0x353   : > { %v993_v0 = vrot.slane %v992_v59, 4 }
 0x354   : > { %v1023_v16 = vsel %vm1010_vm6, %v1022_v56, %v1021_v58 }
 0x355   : > { %v994_v14 = vsel %vm863_vm3, %v993_v0, %v992_v59 }
 0x356   : > { %v996_v57 = vadd.f32 %v994_v14, %v971_v1 }
 0x357   : > { %v1050_v53 = vpop.permute.xlu0 %1049 }
 0x358   : > { %v1051_v15 = vrot.slane %v1050_v53, 4  ;;  %v1025_v52 = vadd.f32 %v1023_v16, %v996_v57 }
 0x35a   : > { %v1052_v18 = vsel %vm683_vm7, %v1051_v15, %v1050_v53 }
 0x35b   : > { %v1103_v19 = vpop.permute.xlu0 %1102  ;;  %v1054_v24 = vadd.f32 %v1052_v18, %v1025_v52 }
 0x35c   : > { %v1075_v20 = vpop.permute.xlu1 %1074  ;;  %v1104_v22 = vrot.slane %v1103_v19, 4 }
 0x35d   : > { %v1076_v23 = vrot.slane %v1075_v20, 4 }
 0x35e   : > { %v1105_v6 = vsel %vm742_vm9, %v1104_v22, %v1103_v19 }
 0x35f   : > { %v1077_v25 = vsel %vm569_vm8, %v1076_v23, %v1075_v20 }
 0x360   : > { %v1079_v51 = vadd.f32 %v1077_v25, %v1054_v24 }
 0x362   : > { %v1107_v27 = vadd.f32 %v1105_v6, %v1079_v51 }
 0x364   : > { %1304 = vrot.lane.b32.xlu1 %v1107_v27, %s2404_s28  ;;  %v1303_v7 = vcombine.high %v1107_v27, %v1107_v27 }
 0x366   : > { %1306 = vrot.lane.b32.xlu0 %v1303_v7, %s2404_s28 }
 0x368   : > { %1112 = vperm.xlu1 %1910, %v1109_v28  }
 0x399   : > { %v1198_v3 = vpop.f32.mrb[0].mxu0 }
 0x39a   : > { %v1200_v8 = vpop.f32.mrb[1].mxu0 }
 0x3d6   : > { %v1305_v30 = vpop.permute.xlu1 %1304 }
 0x3d8   : > { %v1307_v9 = vpop.permute.xlu0 %1306 }
 0x3d9   : > { %v1308_v31 = vsel %vm1216_vm11, %v1305_v30, %v1307_v9 }
 0x3da   : > { %1816 = vmatpush3.msk.msra.mxu0 %vm1222_vm12, %v1308_v31 }
 0x3db   : > { %1475 = vmatprep.subr.mxu0 %v1472_v39  ;;  %1818 = vmatmul.mubr.msk.f32.vlgmr.msra.gmra.mrb[2].mxu0 %vm1218_vm13, %v1295_v13  ;;  %v1632_v39 = vld [vmem:[%s2385_s14] sm:$0xf] }
 0x3e1   : > { %1476 = vmatpush1.xpose.msra.mxu0 %v1470_v26 }
 0x3e2   : > { %1820 = vmatprep.subr.mxu0 %v1927_v4 }
 0x3e7   : > { %v1113_v11 = vpop.permute.xlu1 %1112 }
 0x3e8   : > { %v1199_v2 = vadd.f32 %v1198_v3, %v1113_v11  ;;  %v1201_v10 = vadd.f32 %v1200_v8, %v1113_v11 }
 0x3ea   : > { %1539 = vmatprep.mubr.f32.mxu0 %v1201_v10 }
 0x3eb   : > { %1540 = vmatmul.mubr.f32.vlgmr.msra.gmra.mrb[4].mxu0 %v1199_v2 }
 0x3ec   : > { %1822 = vmatprep.mubr.msk.f32.mxu0 %vm1949_vm10, %v1927_v4 }
 0x4ae   : > { %v1380_v12 = vpop.f32.mrb[2].mxu0 }
 0x4af   : > { %v1819_v32 = vpop.f32.mrb[3].mxu0 }
 0x4be   : > { %v1541_v33 = vpop.f32.mrb[4].mxu0 }
 0x4bf   : > { %v1543_v34 = vpop.f32.mrb[5].mxu0  ;;  %v1545_v36 = vsel %vm1218_vm13, %v1541_v33, -inf }
 0x4c0   : > { %1546 = vmax.xlane.f32.xlu0 %v1545_v36 }
 0x4d6   : > { %1299 = vperm.xlu0 %1911, %v1296_v35  }
 0x54d   : > { %v1547_v38 = vpop.xlane.xlu0 %1546 }
 0x54e   : > { %v1548_v41 = vsub.f32 %v1541_v33, %v1547_v38 }
 0x550   : > { %v1549_v44 = vmul.f32 1.442695, %v1548_v41 }
 0x552   : > { %1912 = vpow2.f32 %v1549_v44 }
 0x555   : > { %v1300_v40 = vpop.permute.xlu0 %1299 }
 0x556   : > { %v1381_v17 = vadd.f32 %v1380_v12, %v1300_v40 }
 0x558   : > { %1821 = vmatpush3.msk.msra.mxu0 %vm1222_vm12, %v1381_v17 }
 0x559   : > { %1825 = vmatprep.subr.mxu0 %v1927_v4 }
 0x55c   : > { %v1913_v21 = vpop.eup %1912 }
 0x55d   : > { %v1551_v47 = vsel %vm1218_vm13, %v1913_v21, 0.0 }
 0x55e   : > { %1552 = vadd.xlane.f32.xlu1 %v1551_v47 }
 0x56f   : > { %1636 = vperm.xlu1 %1910, %v1633_v29  }
 0x5eb   : > { %v1553_v48 = vpop.xlane.xlu1 %1552 }
 0x5ec   : > { %1914 = vrcp.f32 %v1553_v48 }
 0x5ef   : > { %v1637_v5 = vpop.permute.xlu1 %1636 }
 0x5f6   : > { %v1915_v49 = vpop.eup %1914 }
 0x5f7   : > { %v1555_v26 = vmul.f32 %v1915_v49, %v1913_v21 }
 0x5f9   : > { %1823 = vmatmul.mubr.msk.f32.vlgmr.msra.gmra.mrb[6].mxu0 %vm1218_vm13, %v1555_v26 }
 0x5fa   : > { %1827 = vmatprep.mubr.msk.f32.mxu0 %vm1949_vm10, %v1927_v4 }
 0x6cc   : > { %v1628_v50 = vpop.f32.mrb[6].mxu0 }
 0x6cd   : > { %v1824_v54 = vpop.f32.mrb[7].mxu0  ;;  %1826 = vmatpush3.msra.mxu0 %v1628_v50 }
 0x6ce   : > { %1828 = vmatmul.mubr.msk.f32.vlgmr.msra.gmra.mrb[8].mxu0 %vm1128_vm15, %v1632_v39 }
 0x7a1   : > { %v1708_v55 = vpop.f32.mrb[8].mxu0 }
 0x7a2   : > { %v1709_v37 = vadd.f32 %v1708_v55, %v1637_v5  ;;  %v1829_v60 = vpop.f32.mrb[9].mxu0 }
 0x7a4   : > { %1712 = vst.msk [vmem:[%s536_s18] sm:$0xf] %vm2406_vm2, %v1709_v37 }
 0x7a5 PF: > { %s26_s21 = sadd.s32 1, %s1922_s21  }
 0x7a6   : > { %p23_p4 = scmp.ge.s32.totalorder %s26_s21, 4  }
 0x7a8   :  { %25 = sbr.rel (!%p23_p4) target bundleno = 2 (0x2), region = 118 }

</bundles_post_ra>
